<compile_context>
chip_gen: v6e
topology: v6e:2x2x1
jax: 0.10.0
libtpu: 0.0.40
codegen_flags: <defaults>
</compile_context>

<pallas_src>
import functools
import math

import jax
import jax.numpy as jnp
from jax.experimental import pallas as pl
from jax.experimental.pallas import tpu as pltpu


# ---------------------------------------------------------------------------
# Fused per-layer kernel (grid axis = encoder layer)
# ---------------------------------------------------------------------------

def _layernorm(x, g, b, eps):
    mean = jnp.mean(x, axis=-1, keepdims=True)
    var = jnp.mean((x - mean) ** 2, axis=-1, keepdims=True)
    return (x - mean) * jax.lax.rsqrt(var + eps) * g + b


def _bert_layer_kernel(
        emb_ref, mask_ref, eg_ref, eb_ref,
        wqkv_ref, bqkv_ref, wo_ref, bo_ref, ln1g_ref, ln1b_ref,
        w1_ref, b1_ref, w2_ref, b2_ref, ln2g_ref, ln2b_ref,
        pw_ref, pb_ref, cw_ref, cb_ref,
        logits_ref,
        x_ref, ctx_ref,
        *, batch, seq, num_heads, eps, scale):
    H = eg_ref.shape[-1]
    dH = H // num_heads
    BS = batch * seq
    l = pl.program_id(0)

    # -- embedding LayerNorm once, into the persistent hidden-state scratch --
    @pl.when(l == 0)
    def _init():
        x_ref[...] = _layernorm(emb_ref[...], eg_ref[...], eb_ref[...], eps)

    x = x_ref[...]                                            # (B*S, H) f32

    # ---- fused QKV projection: single [H, 3H] bf16 matmul, f32 accumulate ----
    qkv = jnp.dot(x.astype(jnp.bfloat16), wqkv_ref[...],
                  preferred_element_type=jnp.float32) + bqkv_ref[...]   # (B*S, 3H)
    q = qkv[:, 0 * H:1 * H].reshape(batch, seq, H).astype(jnp.bfloat16)
    k = qkv[:, 1 * H:2 * H].reshape(batch, seq, H).astype(jnp.bfloat16)
    v = qkv[:, 2 * H:3 * H].reshape(batch, seq, H).astype(jnp.bfloat16)
    m = mask_ref[...]                                         # (B, 1, S) additive

    # ---- self-attention: batched-over-B matmuls per head; context written
    #      into VMEM scratch at static lane slices (no concatenates) ----
    for h in range(num_heads):
        cols = slice(h * dH, (h + 1) * dH)
        s = jnp.einsum('bqd,bkd->bqk', q[:, :, cols], k[:, :, cols],
                       preferred_element_type=jnp.float32) * scale + m  # (B,S,S) f32
        s = s - jnp.max(s, axis=-1, keepdims=True)
        p = jnp.exp(s)
        p = p / jnp.sum(p, axis=-1, keepdims=True)            # exact divide
        ctxh = jnp.einsum('bqk,bkd->bqd', p.astype(jnp.bfloat16), v[:, :, cols],
                          preferred_element_type=jnp.float32)  # (B, S, dH) f32
        ctx_ref[:, cols] = ctxh.reshape(BS, dH)

    # ---- attention output projection + residual + LayerNorm ----
    attn = jnp.dot(ctx_ref[...].astype(jnp.bfloat16), wo_ref[...],
                   preferred_element_type=jnp.float32) + bo_ref[...]
    x = _layernorm(attn + x, ln1g_ref[...], ln1b_ref[...], eps)

    # ---- FFN + residual + LayerNorm (GELU in f32) ----
    h1 = jnp.dot(x.astype(jnp.bfloat16), w1_ref[...],
                 preferred_element_type=jnp.float32) + b1_ref[...]
    h1 = jax.nn.gelu(h1, approximate=True)   # TODO(synk): exact erf-GELU like HF default.
    h2 = jnp.dot(h1.astype(jnp.bfloat16), w2_ref[...],
                 preferred_element_type=jnp.float32) + b2_ref[...]
    x_ref[...] = _layernorm(h2 + x, ln2g_ref[...], ln2b_ref[...], eps)

    # ---- pooler (CLS) + classifier on the last layer; lane-dense output ----
    @pl.when(l == pl.num_programs(0) - 1)
    def _finalize():
        cls = x_ref[pl.ds(0, batch, stride=seq), :]           # (B, H) strided CLS read
        pooled = jnp.tanh(
            jnp.dot(cls.astype(jnp.bfloat16), pw_ref[...],
                    preferred_element_type=jnp.float32) + pb_ref[...])
        logits = jnp.dot(pooled.astype(jnp.bfloat16), cw_ref[...],
                         preferred_element_type=jnp.float32) + cb_ref[...]
        logits_ref[...] = logits.astype(logits_ref.dtype)     # (B, 128) lane-dense


# ---------------------------------------------------------------------------
# Parameter init (deterministic, synthetic BERT config; layer params stacked)
# ---------------------------------------------------------------------------

LANE_PAD = 128  # classifier output padded to a lane-dense width


def init_params(key, *, vocab=128, max_pos=16, type_vocab=2, H=32, nH=4,
                inter=64, num_layers=2, num_labels=3):
    std = 0.02
    ks = iter(jax.random.split(key, 8 + 6 * num_layers))

    def nrm(shape, dtype=jnp.float32):
        return (std * jax.random.normal(next(ks), shape, jnp.float32)).astype(dtype)

    params = {
        "num_heads": nH,
        "num_labels": num_labels,
        "word_emb": nrm((vocab, H)),
        "pos_emb": nrm((max_pos, H)),
        "type_emb": nrm((type_vocab, H)),
        "emb_ln_g": jnp.ones((1, H), jnp.float32),
        "emb_ln_b": jnp.zeros((1, H), jnp.float32),
    }

    wqkv, wo, w1, w2 = [], [], [], []
    for _ in range(num_layers):
        wq = nrm((H, H), jnp.bfloat16)
        wk = nrm((H, H), jnp.bfloat16)
        wv = nrm((H, H), jnp.bfloat16)
        wqkv.append(jnp.concatenate([wq, wk, wv], axis=-1))   # (H, 3H) bf16
        wo.append(nrm((H, H), jnp.bfloat16))
        w1.append(nrm((H, inter), jnp.bfloat16))
        w2.append(nrm((inter, H), jnp.bfloat16))

    cls_w = jnp.zeros((H, LANE_PAD), jnp.bfloat16)
    cls_w = cls_w.at[:, :num_labels].set(nrm((H, num_labels), jnp.bfloat16))

    params.update({
        "wqkv": jnp.stack(wqkv),                               # (L, H, 3H) bf16
        "bqkv": jnp.zeros((num_layers, 1, 3 * H), jnp.float32),
        "wo": jnp.stack(wo),                                   # (L, H, H)  bf16
        "bo": jnp.zeros((num_layers, 1, H), jnp.float32),
        "ln1_g": jnp.ones((num_layers, 1, H), jnp.float32),
        "ln1_b": jnp.zeros((num_layers, 1, H), jnp.float32),
        "w1": jnp.stack(w1),                                   # (L, H, I)  bf16
        "b1": jnp.zeros((num_layers, 1, inter), jnp.float32),
        "w2": jnp.stack(w2),                                   # (L, I, H)  bf16
        "b2": jnp.zeros((num_layers, 1, H), jnp.float32),
        "ln2_g": jnp.ones((num_layers, 1, H), jnp.float32),
        "ln2_b": jnp.zeros((num_layers, 1, H), jnp.float32),
        "pool_w": nrm((H, H), jnp.bfloat16),
        "pool_b": jnp.zeros((1, H), jnp.float32),
        "cls_w": cls_w,                                        # (H, 128) bf16, zero-padded
        "cls_b": jnp.zeros((1, LANE_PAD), jnp.float32),
    })
    return params


# ---------------------------------------------------------------------------
# Forward pass  (== PureBERTModel.forward -> logits)
# ---------------------------------------------------------------------------

def bert_forward(params, input_ids, attention_mask, token_type_ids=None):
    B, S = input_ids.shape
    H = params["word_emb"].shape[1]
    nH = params["num_heads"]
    L = params["wqkv"].shape[0]
    inter = params["w1"].shape[2]
    NL = params["num_labels"]
    dH = H // nH
    if token_type_ids is None:
        token_type_ids = jnp.zeros_like(input_ids)

    # Embedding gathers stay in plain JAX (glue); everything downstream runs in
    # one layer-streamed Pallas kernel, with activations resident in VMEM.
    # TODO(synk): fold the gather into the kernel via PrefetchScalarGridSpec +
    # pl.Element row gather to avoid the HBM round trip of emb at real sizes.
    emb = (params["word_emb"][input_ids]
           + params["pos_emb"][jnp.arange(S)][None, :, :]
           + params["type_emb"][token_type_ids])
    emb = emb.reshape(B * S, H).astype(jnp.float32)

    # HF-style extended additive mask: 0 keep, large negative for pad.
    mask_add = ((1.0 - attention_mask.astype(jnp.float32)) * (-1e9)).reshape(B, 1, S)

    kernel = functools.partial(
        _bert_layer_kernel,
        batch=B, seq=S, num_heads=nH, eps=1e-12, scale=1.0 / math.sqrt(dH))

    # Residents (emb, mask, embedding-LN, pooler, classifier) use constant
    # index maps; per-layer weights are streamed with index_map l -> (l, 0, 0)
    # (Pallas double-buffers the layer-l+1 DMA behind layer-l compute).
    grid_spec = pltpu.PrefetchScalarGridSpec(
        num_scalar_prefetch=0,
        grid=(L,),
        in_specs=[
            pl.BlockSpec((B * S, H), lambda l: (0, 0)),            # emb
            pl.BlockSpec((B, 1, S), lambda l: (0, 0, 0)),          # additive mask
            pl.BlockSpec((1, H), lambda l: (0, 0)),                # emb LN gamma
            pl.BlockSpec((1, H), lambda l: (0, 0)),                # emb LN beta
            pl.BlockSpec((None, H, 3 * H), lambda l: (l, 0, 0)),   # wqkv (streamed)
            pl.BlockSpec((None, 1, 3 * H), lambda l: (l, 0, 0)),   # bqkv
            pl.BlockSpec((None, H, H), lambda l: (l, 0, 0)),       # wo
            pl.BlockSpec((None, 1, H), lambda l: (l, 0, 0)),       # bo
            pl.BlockSpec((None, 1, H), lambda l: (l, 0, 0)),       # ln1 gamma
            pl.BlockSpec((None, 1, H), lambda l: (l, 0, 0)),       # ln1 beta
            pl.BlockSpec((None, H, inter), lambda l: (l, 0, 0)),   # w1
            pl.BlockSpec((None, 1, inter), lambda l: (l, 0, 0)),   # b1
            pl.BlockSpec((None, inter, H), lambda l: (l, 0, 0)),   # w2
            pl.BlockSpec((None, 1, H), lambda l: (l, 0, 0)),       # b2
            pl.BlockSpec((None, 1, H), lambda l: (l, 0, 0)),       # ln2 gamma
            pl.BlockSpec((None, 1, H), lambda l: (l, 0, 0)),       # ln2 beta
            pl.BlockSpec((H, H), lambda l: (0, 0)),                # pooler W
            pl.BlockSpec((1, H), lambda l: (0, 0)),                # pooler b
            pl.BlockSpec((H, LANE_PAD), lambda l: (0, 0)),         # classifier W (padded)
            pl.BlockSpec((1, LANE_PAD), lambda l: (0, 0)),         # classifier b (padded)
        ],
        out_specs=pl.BlockSpec((B, LANE_PAD), lambda l: (0, 0)),
        scratch_shapes=[
            pltpu.VMEM((B * S, H), jnp.float32),                   # hidden state x
            pltpu.VMEM((B * S, H), jnp.float32),                   # attention context
        ],
    )

    logits_padded = pl.pallas_call(
        kernel,
        grid_spec=grid_spec,
        out_shape=jax.ShapeDtypeStruct((B, LANE_PAD), jnp.float32),
        compiler_params=pltpu.CompilerParams(
            dimension_semantics=("arbitrary",)),
        # TODO(synk): at real sizes add a leading "parallel" batch/row grid axis
        # (v7x has 2 TensorCores) and set vmem_limit_bytes explicitly.
    )(emb, mask_add,
      params["emb_ln_g"], params["emb_ln_b"],
      params["wqkv"], params["bqkv"],
      params["wo"], params["bo"],
      params["ln1_g"], params["ln1_b"],
      params["w1"], params["b1"],
      params["w2"], params["b2"],
      params["ln2_g"], params["ln2_b"],
      params["pool_w"], params["pool_b"],
      params["cls_w"], params["cls_b"])

    return logits_padded[:, :NL]


# ---------------------------------------------------------------------------
# Main
# ---------------------------------------------------------------------------

if __name__ == "__main__":
    B, S = 2, 8
    VOCAB, NUM_LABELS = 128, 3

    key = jax.random.PRNGKey(0)
    k_param, k_ids = jax.random.split(key)

    params = init_params(k_param, vocab=VOCAB, max_pos=16, type_vocab=2,
                         H=32, nH=4, inter=64, num_layers=2,
                         num_labels=NUM_LABELS)

    input_ids = jax.random.randint(k_ids, (B, S), 0, VOCAB, dtype=jnp.int32)
    attention_mask = jnp.array(
        [[1, 1, 1, 1, 1, 1, 1, 1],
         [1, 1, 1, 1, 1, 1, 0, 0]], dtype=jnp.int32)
    token_type_ids = jnp.zeros((B, S), dtype=jnp.int32)

    logits = bert_forward(params, input_ids, attention_mask, token_type_ids)
    logits = jax.block_until_ready(logits)
    assert logits.shape == (B, NUM_LABELS)
    assert bool(jnp.all(jnp.isfinite(logits)))
    print("KERNEL_OK")
</pallas_src>

<mosaic_0001>
module attributes {stable_mosaic.version = 11 : i64} {
  func.func @_bert_layer_kernel(%arg0: i32, %arg1: memref<16x32xf32, #tpu.memory_space<vmem>>, %arg2: memref<2x1x8xf32, #tpu.memory_space<vmem>>, %arg3: memref<1x32xf32, #tpu.memory_space<vmem>>, %arg4: memref<1x32xf32, #tpu.memory_space<vmem>>, %arg5: memref<1x32x96xbf16, #tpu.memory_space<vmem>>, %arg6: memref<1x1x96xf32, #tpu.memory_space<vmem>>, %arg7: memref<1x32x32xbf16, #tpu.memory_space<vmem>>, %arg8: memref<1x1x32xf32, #tpu.memory_space<vmem>>, %arg9: memref<1x1x32xf32, #tpu.memory_space<vmem>>, %arg10: memref<1x1x32xf32, #tpu.memory_space<vmem>>, %arg11: memref<1x32x64xbf16, #tpu.memory_space<vmem>>, %arg12: memref<1x1x64xf32, #tpu.memory_space<vmem>>, %arg13: memref<1x64x32xbf16, #tpu.memory_space<vmem>>, %arg14: memref<1x1x32xf32, #tpu.memory_space<vmem>>, %arg15: memref<1x1x32xf32, #tpu.memory_space<vmem>>, %arg16: memref<1x1x32xf32, #tpu.memory_space<vmem>>, %arg17: memref<32x32xbf16, #tpu.memory_space<vmem>>, %arg18: memref<1x32xf32, #tpu.memory_space<vmem>>, %arg19: memref<32x128xbf16, #tpu.memory_space<vmem>>, %arg20: memref<1x128xf32, #tpu.memory_space<vmem>>, %arg21: memref<2x128xf32, #tpu.memory_space<vmem>>, %arg22: memref<16x32xf32, #tpu.memory_space<vmem>>, %arg23: memref<16x32xf32, #tpu.memory_space<vmem>>) attributes {dimension_semantics = [#tpu.dimension_semantics<arbitrary>], iteration_bounds = array<i64: 2>, scalar_prefetch = 0 : i64, scratch_operands = 2 : i64, tpu.core_type = #tpu.core_type<tc>, window_params = [{pipeline_mode = #tpu.pipeline_mode<synchronous>, transform_indices = @transform_0, window_bounds = array<i64: 16, 32>}, {pipeline_mode = #tpu.pipeline_mode<synchronous>, transform_indices = @transform_1, window_bounds = array<i64: 2, 1, 8>}, {pipeline_mode = #tpu.pipeline_mode<synchronous>, transform_indices = @transform_2, window_bounds = array<i64: 1, 32>}, {pipeline_mode = #tpu.pipeline_mode<synchronous>, transform_indices = @transform_3, window_bounds = array<i64: 1, 32>}, {transform_indices = @transform_4, window_bounds = array<i64: 1, 32, 96>}, {transform_indices = @transform_5, window_bounds = array<i64: 1, 1, 96>}, {transform_indices = @transform_6, window_bounds = array<i64: 1, 32, 32>}, {transform_indices = @transform_7, window_bounds = array<i64: 1, 1, 32>}, {transform_indices = @transform_8, window_bounds = array<i64: 1, 1, 32>}, {transform_indices = @transform_9, window_bounds = array<i64: 1, 1, 32>}, {transform_indices = @transform_10, window_bounds = array<i64: 1, 32, 64>}, {transform_indices = @transform_11, window_bounds = array<i64: 1, 1, 64>}, {transform_indices = @transform_12, window_bounds = array<i64: 1, 64, 32>}, {transform_indices = @transform_13, window_bounds = array<i64: 1, 1, 32>}, {transform_indices = @transform_14, window_bounds = array<i64: 1, 1, 32>}, {transform_indices = @transform_15, window_bounds = array<i64: 1, 1, 32>}, {pipeline_mode = #tpu.pipeline_mode<synchronous>, transform_indices = @transform_16, window_bounds = array<i64: 32, 32>}, {pipeline_mode = #tpu.pipeline_mode<synchronous>, transform_indices = @transform_17, window_bounds = array<i64: 1, 32>}, {pipeline_mode = #tpu.pipeline_mode<synchronous>, transform_indices = @transform_18, window_bounds = array<i64: 32, 128>}, {pipeline_mode = #tpu.pipeline_mode<synchronous>, transform_indices = @transform_19, window_bounds = array<i64: 1, 128>}, {pipeline_mode = #tpu.pipeline_mode<synchronous>, transform_indices = @transform_20, window_bounds = array<i64: 2, 128>}]} {
    %c0_i32 = arith.constant 0 : i32
    %0 = arith.cmpi eq, %arg0, %c0_i32 : i32
    %1 = arith.extui %0 : i1 to i32
    %c0_i32_0 = arith.constant 0 : i32
    %2 = arith.cmpi ne, %1, %c0_i32_0 : i32
    scf.if %2 {
      %c0_88 = arith.constant 0 : index
      %c0_89 = arith.constant 0 : index
      %202 = vector.load %arg1[%c0_88, %c0_89] : memref<16x32xf32, #tpu.memory_space<vmem>>, vector<16x32xf32>
      %c0_90 = arith.constant 0 : index
      %c0_91 = arith.constant 0 : index
      %203 = vector.load %arg3[%c0_90, %c0_91] : memref<1x32xf32, #tpu.memory_space<vmem>>, vector<1x32xf32>
      %c0_92 = arith.constant 0 : index
      %c0_93 = arith.constant 0 : index
      %204 = vector.load %arg4[%c0_92, %c0_93] : memref<1x32xf32, #tpu.memory_space<vmem>>, vector<1x32xf32>
      %cst_94 = arith.constant dense<0.000000e+00> : vector<16xf32>
      %205 = vector.multi_reduction <add>, %202, %cst_94 [1] : vector<16x32xf32> to vector<16xf32>
      %206 = vector.shape_cast %205 : vector<16xf32> to vector<16x1xf32>
      %cst_95 = arith.constant 3.200000e+01 : f32
      %207 = vector.broadcast %cst_95 : f32 to vector<16x1xf32>
      %208 = arith.divf %206, %207 : vector<16x1xf32>
      %209 = vector.broadcast %208 : vector<16x1xf32> to vector<16x32xf32>
      %210 = arith.subf %202, %209 : vector<16x32xf32>
      %211 = arith.mulf %210, %210 : vector<16x32xf32>
      %cst_96 = arith.constant dense<0.000000e+00> : vector<16xf32>
      %212 = vector.multi_reduction <add>, %211, %cst_96 [1] : vector<16x32xf32> to vector<16xf32>
      %213 = vector.shape_cast %212 : vector<16xf32> to vector<16x1xf32>
      %cst_97 = arith.constant 3.200000e+01 : f32
      %214 = vector.broadcast %cst_97 : f32 to vector<16x1xf32>
      %215 = arith.divf %213, %214 : vector<16x1xf32>
      %216 = vector.broadcast %208 : vector<16x1xf32> to vector<16x32xf32>
      %217 = arith.subf %202, %216 : vector<16x32xf32>
      %cst_98 = arith.constant 9.99999996E-13 : f32
      %218 = vector.broadcast %cst_98 : f32 to vector<16x1xf32>
      %219 = arith.addf %215, %218 : vector<16x1xf32>
      %220 = math.rsqrt %219 : vector<16x1xf32>
      %221 = vector.broadcast %220 : vector<16x1xf32> to vector<16x32xf32>
      %222 = arith.mulf %217, %221 : vector<16x32xf32>
      %223 = vector.broadcast %203 : vector<1x32xf32> to vector<16x32xf32>
      %224 = arith.mulf %222, %223 : vector<16x32xf32>
      %225 = vector.broadcast %204 : vector<1x32xf32> to vector<16x32xf32>
      %226 = arith.addf %224, %225 : vector<16x32xf32>
      %c0_99 = arith.constant 0 : index
      %c0_100 = arith.constant 0 : index
      %227 = vector.load %arg22[%c0_99, %c0_100] : memref<16x32xf32, #tpu.memory_space<vmem>>, vector<16x32xf32>
      tpu.vector_store %arg22[%c0_99, %c0_100], %226 {strides = array<i32>} : memref<16x32xf32, #tpu.memory_space<vmem>>, vector<16x32xf32>,
    } else {
    }
    %c0 = arith.constant 0 : index
    %c0_1 = arith.constant 0 : index
    %3 = vector.load %arg22[%c0, %c0_1] : memref<16x32xf32, #tpu.memory_space<vmem>>, vector<16x32xf32>
    %4 = arith.truncf %3 : vector<16x32xf32> to vector<16x32xbf16>
    %c0_2 = arith.constant 0 : index
    %c0_3 = arith.constant 0 : index
    %c0_4 = arith.constant 0 : index
    %5 = vector.load %arg5[%c0_2, %c0_3, %c0_4] : memref<1x32x96xbf16, #tpu.memory_space<vmem>>, vector<1x32x96xbf16>
    %6 = vector.shape_cast %5 : vector<1x32x96xbf16> to vector<32x96xbf16>
    %cst = arith.constant dense<0.000000e+00> : vector<16x96xf32>
    %7 = tpu.matmul %4, %6, %cst {dimension_numbers = #tpu.dot_dimension_numbers<[1], [0], [0], [1], [0, 0, 1, 1], [], []>} : vector<16x32xbf16>, vector<32x96xbf16>, vector<16x96xf32> -> vector<16x96xf32>
    %c0_5 = arith.constant 0 : index
    %c0_6 = arith.constant 0 : index
    %c0_7 = arith.constant 0 : index
    %8 = vector.load %arg6[%c0_5, %c0_6, %c0_7] : memref<1x1x96xf32, #tpu.memory_space<vmem>>, vector<1x1x96xf32>
    %9 = vector.shape_cast %8 : vector<1x1x96xf32> to vector<1x96xf32>
    %10 = vector.broadcast %9 : vector<1x96xf32> to vector<16x96xf32>
    %11 = arith.addf %7, %10 : vector<16x96xf32>
    %12 = vector.extract_strided_slice %11 {offsets = [0, 0], sizes = [16, 32], strides = [1, 1]} : vector<16x96xf32> to vector<16x32xf32>
    %13 = vector.shape_cast %12 : vector<16x32xf32> to vector<2x8x32xf32>
    %14 = arith.truncf %13 : vector<2x8x32xf32> to vector<2x8x32xbf16>
    %15 = vector.extract_strided_slice %11 {offsets = [0, 32], sizes = [16, 32], strides = [1, 1]} : vector<16x96xf32> to vector<16x32xf32>
    %16 = vector.shape_cast %15 : vector<16x32xf32> to vector<2x8x32xf32>
    %17 = arith.truncf %16 : vector<2x8x32xf32> to vector<2x8x32xbf16>
    %18 = vector.extract_strided_slice %11 {offsets = [0, 64], sizes = [16, 32], strides = [1, 1]} : vector<16x96xf32> to vector<16x32xf32>
    %19 = vector.shape_cast %18 : vector<16x32xf32> to vector<2x8x32xf32>
    %20 = arith.truncf %19 : vector<2x8x32xf32> to vector<2x8x32xbf16>
    %c0_8 = arith.constant 0 : index
    %c0_9 = arith.constant 0 : index
    %c0_10 = arith.constant 0 : index
    %21 = vector.load %arg2[%c0_8, %c0_9, %c0_10] : memref<2x1x8xf32, #tpu.memory_space<vmem>>, vector<2x1x8xf32>
    %22 = vector.extract_strided_slice %14 {offsets = [0, 0, 0], sizes = [2, 8, 8], strides = [1, 1, 1]} : vector<2x8x32xbf16> to vector<2x8x8xbf16>
    %23 = vector.extract_strided_slice %17 {offsets = [0, 0, 0], sizes = [2, 8, 8], strides = [1, 1, 1]} : vector<2x8x32xbf16> to vector<2x8x8xbf16>
    "tpu.trace_start"() <{level = 10 : i32, message = "bqd,bkd->bqk"}> : () -> ()
    %cst_11 = arith.constant dense<0.000000e+00> : vector<2x8x8xf32>
    %24 = tpu.matmul %22, %23, %cst_11 {dimension_numbers = #tpu.dot_dimension_numbers<[2], [2], [1], [1], [0, 0, 0, 1, 1, 1], [0], [0]>} : vector<2x8x8xbf16>, vector<2x8x8xbf16>, vector<2x8x8xf32> -> vector<2x8x8xf32>
    "tpu.trace_stop"() : () -> ()
    %cst_12 = arith.constant 0.353553385 : f32
    %25 = vector.broadcast %cst_12 : f32 to vector<2x8x8xf32>
    %26 = arith.mulf %24, %25 : vector<2x8x8xf32>
    %27 = vector.broadcast %21 : vector<2x1x8xf32> to vector<2x8x8xf32>
    %28 = arith.addf %26, %27 : vector<2x8x8xf32>
    %cst_13 = arith.constant dense<0xFF800000> : vector<2x8xf32>
    %29 = vector.multi_reduction <maximumf>, %28, %cst_13 [2] : vector<2x8x8xf32> to vector<2x8xf32>
    %30 = vector.shape_cast %29 : vector<2x8xf32> to vector<2x8x1xf32>
    %31 = vector.broadcast %30 : vector<2x8x1xf32> to vector<2x8x8xf32>
    %32 = arith.subf %28, %31 : vector<2x8x8xf32>
    %33 = math.exp %32 : vector<2x8x8xf32>
    %cst_14 = arith.constant dense<0.000000e+00> : vector<2x8xf32>
    %34 = vector.multi_reduction <add>, %33, %cst_14 [2] : vector<2x8x8xf32> to vector<2x8xf32>
    %35 = vector.shape_cast %34 : vector<2x8xf32> to vector<2x8x1xf32>
    %36 = vector.broadcast %35 : vector<2x8x1xf32> to vector<2x8x8xf32>
    %37 = arith.divf %33, %36 : vector<2x8x8xf32>
    %38 = arith.truncf %37 : vector<2x8x8xf32> to vector<2x8x8xbf16>
    %39 = vector.extract_strided_slice %20 {offsets = [0, 0, 0], sizes = [2, 8, 8], strides = [1, 1, 1]} : vector<2x8x32xbf16> to vector<2x8x8xbf16>
    "tpu.trace_start"() <{level = 10 : i32, message = "bqk,bkd->bqd"}> : () -> ()
    %cst_15 = arith.constant dense<0.000000e+00> : vector<2x8x8xf32>
    %40 = tpu.matmul %38, %39, %cst_15 {dimension_numbers = #tpu.dot_dimension_numbers<[2], [1], [1], [2], [0, 0, 0, 1, 1, 2], [0], [0]>} : vector<2x8x8xbf16>, vector<2x8x8xbf16>, vector<2x8x8xf32> -> vector<2x8x8xf32>
    "tpu.trace_stop"() : () -> ()
    %41 = vector.shape_cast %40 : vector<2x8x8xf32> to vector<16x8xf32>
    %c0_16 = arith.constant 0 : index
    %c0_17 = arith.constant 0 : index
    %42 = vector.load %arg23[%c0_16, %c0_17] : memref<16x32xf32, #tpu.memory_space<vmem>>, vector<16x8xf32>
    tpu.vector_store %arg23[%c0_16, %c0_17], %41 {strides = array<i32>} : memref<16x32xf32, #tpu.memory_space<vmem>>, vector<16x8xf32>,
    %43 = vector.extract_strided_slice %14 {offsets = [0, 0, 8], sizes = [2, 8, 8], strides = [1, 1, 1]} : vector<2x8x32xbf16> to vector<2x8x8xbf16>
    %44 = vector.extract_strided_slice %17 {offsets = [0, 0, 8], sizes = [2, 8, 8], strides = [1, 1, 1]} : vector<2x8x32xbf16> to vector<2x8x8xbf16>
    "tpu.trace_start"() <{level = 10 : i32, message = "bqd,bkd->bqk"}> : () -> ()
    %cst_18 = arith.constant dense<0.000000e+00> : vector<2x8x8xf32>
    %45 = tpu.matmul %43, %44, %cst_18 {dimension_numbers = #tpu.dot_dimension_numbers<[2], [2], [1], [1], [0, 0, 0, 1, 1, 1], [0], [0]>} : vector<2x8x8xbf16>, vector<2x8x8xbf16>, vector<2x8x8xf32> -> vector<2x8x8xf32>
    "tpu.trace_stop"() : () -> ()
    %cst_19 = arith.constant 0.353553385 : f32
    %46 = vector.broadcast %cst_19 : f32 to vector<2x8x8xf32>
    %47 = arith.mulf %45, %46 : vector<2x8x8xf32>
    %48 = vector.broadcast %21 : vector<2x1x8xf32> to vector<2x8x8xf32>
    %49 = arith.addf %47, %48 : vector<2x8x8xf32>
    %cst_20 = arith.constant dense<0xFF800000> : vector<2x8xf32>
    %50 = vector.multi_reduction <maximumf>, %49, %cst_20 [2] : vector<2x8x8xf32> to vector<2x8xf32>
    %51 = vector.shape_cast %50 : vector<2x8xf32> to vector<2x8x1xf32>
    %52 = vector.broadcast %51 : vector<2x8x1xf32> to vector<2x8x8xf32>
    %53 = arith.subf %49, %52 : vector<2x8x8xf32>
    %54 = math.exp %53 : vector<2x8x8xf32>
    %cst_21 = arith.constant dense<0.000000e+00> : vector<2x8xf32>
    %55 = vector.multi_reduction <add>, %54, %cst_21 [2] : vector<2x8x8xf32> to vector<2x8xf32>
    %56 = vector.shape_cast %55 : vector<2x8xf32> to vector<2x8x1xf32>
    %57 = vector.broadcast %56 : vector<2x8x1xf32> to vector<2x8x8xf32>
    %58 = arith.divf %54, %57 : vector<2x8x8xf32>
    %59 = arith.truncf %58 : vector<2x8x8xf32> to vector<2x8x8xbf16>
    %60 = vector.extract_strided_slice %20 {offsets = [0, 0, 8], sizes = [2, 8, 8], strides = [1, 1, 1]} : vector<2x8x32xbf16> to vector<2x8x8xbf16>
    "tpu.trace_start"() <{level = 10 : i32, message = "bqk,bkd->bqd"}> : () -> ()
    %cst_22 = arith.constant dense<0.000000e+00> : vector<2x8x8xf32>
    %61 = tpu.matmul %59, %60, %cst_22 {dimension_numbers = #tpu.dot_dimension_numbers<[2], [1], [1], [2], [0, 0, 0, 1, 1, 2], [0], [0]>} : vector<2x8x8xbf16>, vector<2x8x8xbf16>, vector<2x8x8xf32> -> vector<2x8x8xf32>
    "tpu.trace_stop"() : () -> ()
    %62 = vector.shape_cast %61 : vector<2x8x8xf32> to vector<16x8xf32>
    %c0_23 = arith.constant 0 : index
    %c8 = arith.constant 8 : index
    %63 = vector.load %arg23[%c0_23, %c8] : memref<16x32xf32, #tpu.memory_space<vmem>>, vector<16x8xf32>
    tpu.vector_store %arg23[%c0_23, %c8], %62 {strides = array<i32>} : memref<16x32xf32, #tpu.memory_space<vmem>>, vector<16x8xf32>,
    %64 = vector.extract_strided_slice %14 {offsets = [0, 0, 16], sizes = [2, 8, 8], strides = [1, 1, 1]} : vector<2x8x32xbf16> to vector<2x8x8xbf16>
    %65 = vector.extract_strided_slice %17 {offsets = [0, 0, 16], sizes = [2, 8, 8], strides = [1, 1, 1]} : vector<2x8x32xbf16> to vector<2x8x8xbf16>
    "tpu.trace_start"() <{level = 10 : i32, message = "bqd,bkd->bqk"}> : () -> ()
    %cst_24 = arith.constant dense<0.000000e+00> : vector<2x8x8xf32>
    %66 = tpu.matmul %64, %65, %cst_24 {dimension_numbers = #tpu.dot_dimension_numbers<[2], [2], [1], [1], [0, 0, 0, 1, 1, 1], [0], [0]>} : vector<2x8x8xbf16>, vector<2x8x8xbf16>, vector<2x8x8xf32> -> vector<2x8x8xf32>
    "tpu.trace_stop"() : () -> ()
    %cst_25 = arith.constant 0.353553385 : f32
    %67 = vector.broadcast %cst_25 : f32 to vector<2x8x8xf32>
    %68 = arith.mulf %66, %67 : vector<2x8x8xf32>
    %69 = vector.broadcast %21 : vector<2x1x8xf32> to vector<2x8x8xf32>
    %70 = arith.addf %68, %69 : vector<2x8x8xf32>
    %cst_26 = arith.constant dense<0xFF800000> : vector<2x8xf32>
    %71 = vector.multi_reduction <maximumf>, %70, %cst_26 [2] : vector<2x8x8xf32> to vector<2x8xf32>
    %72 = vector.shape_cast %71 : vector<2x8xf32> to vector<2x8x1xf32>
    %73 = vector.broadcast %72 : vector<2x8x1xf32> to vector<2x8x8xf32>
    %74 = arith.subf %70, %73 : vector<2x8x8xf32>
    %75 = math.exp %74 : vector<2x8x8xf32>
    %cst_27 = arith.constant dense<0.000000e+00> : vector<2x8xf32>
    %76 = vector.multi_reduction <add>, %75, %cst_27 [2] : vector<2x8x8xf32> to vector<2x8xf32>
    %77 = vector.shape_cast %76 : vector<2x8xf32> to vector<2x8x1xf32>
    %78 = vector.broadcast %77 : vector<2x8x1xf32> to vector<2x8x8xf32>
    %79 = arith.divf %75, %78 : vector<2x8x8xf32>
    %80 = arith.truncf %79 : vector<2x8x8xf32> to vector<2x8x8xbf16>
    %81 = vector.extract_strided_slice %20 {offsets = [0, 0, 16], sizes = [2, 8, 8], strides = [1, 1, 1]} : vector<2x8x32xbf16> to vector<2x8x8xbf16>
    "tpu.trace_start"() <{level = 10 : i32, message = "bqk,bkd->bqd"}> : () -> ()
    %cst_28 = arith.constant dense<0.000000e+00> : vector<2x8x8xf32>
    %82 = tpu.matmul %80, %81, %cst_28 {dimension_numbers = #tpu.dot_dimension_numbers<[2], [1], [1], [2], [0, 0, 0, 1, 1, 2], [0], [0]>} : vector<2x8x8xbf16>, vector<2x8x8xbf16>, vector<2x8x8xf32> -> vector<2x8x8xf32>
    "tpu.trace_stop"() : () -> ()
    %83 = vector.shape_cast %82 : vector<2x8x8xf32> to vector<16x8xf32>
    %c0_29 = arith.constant 0 : index
    %c16 = arith.constant 16 : index
    %84 = vector.load %arg23[%c0_29, %c16] : memref<16x32xf32, #tpu.memory_space<vmem>>, vector<16x8xf32>
    tpu.vector_store %arg23[%c0_29, %c16], %83 {strides = array<i32>} : memref<16x32xf32, #tpu.memory_space<vmem>>, vector<16x8xf32>,
    %85 = vector.extract_strided_slice %14 {offsets = [0, 0, 24], sizes = [2, 8, 8], strides = [1, 1, 1]} : vector<2x8x32xbf16> to vector<2x8x8xbf16>
    %86 = vector.extract_strided_slice %17 {offsets = [0, 0, 24], sizes = [2, 8, 8], strides = [1, 1, 1]} : vector<2x8x32xbf16> to vector<2x8x8xbf16>
    "tpu.trace_start"() <{level = 10 : i32, message = "bqd,bkd->bqk"}> : () -> ()
    %cst_30 = arith.constant dense<0.000000e+00> : vector<2x8x8xf32>
    %87 = tpu.matmul %85, %86, %cst_30 {dimension_numbers = #tpu.dot_dimension_numbers<[2], [2], [1], [1], [0, 0, 0, 1, 1, 1], [0], [0]>} : vector<2x8x8xbf16>, vector<2x8x8xbf16>, vector<2x8x8xf32> -> vector<2x8x8xf32>
    "tpu.trace_stop"() : () -> ()
    %cst_31 = arith.constant 0.353553385 : f32
    %88 = vector.broadcast %cst_31 : f32 to vector<2x8x8xf32>
    %89 = arith.mulf %87, %88 : vector<2x8x8xf32>
    %90 = vector.broadcast %21 : vector<2x1x8xf32> to vector<2x8x8xf32>
    %91 = arith.addf %89, %90 : vector<2x8x8xf32>
    %cst_32 = arith.constant dense<0xFF800000> : vector<2x8xf32>
    %92 = vector.multi_reduction <maximumf>, %91, %cst_32 [2] : vector<2x8x8xf32> to vector<2x8xf32>
    %93 = vector.shape_cast %92 : vector<2x8xf32> to vector<2x8x1xf32>
    %94 = vector.broadcast %93 : vector<2x8x1xf32> to vector<2x8x8xf32>
    %95 = arith.subf %91, %94 : vector<2x8x8xf32>
    %96 = math.exp %95 : vector<2x8x8xf32>
    %cst_33 = arith.constant dense<0.000000e+00> : vector<2x8xf32>
    %97 = vector.multi_reduction <add>, %96, %cst_33 [2] : vector<2x8x8xf32> to vector<2x8xf32>
    %98 = vector.shape_cast %97 : vector<2x8xf32> to vector<2x8x1xf32>
    %99 = vector.broadcast %98 : vector<2x8x1xf32> to vector<2x8x8xf32>
    %100 = arith.divf %96, %99 : vector<2x8x8xf32>
    %101 = arith.truncf %100 : vector<2x8x8xf32> to vector<2x8x8xbf16>
    %102 = vector.extract_strided_slice %20 {offsets = [0, 0, 24], sizes = [2, 8, 8], strides = [1, 1, 1]} : vector<2x8x32xbf16> to vector<2x8x8xbf16>
    "tpu.trace_start"() <{level = 10 : i32, message = "bqk,bkd->bqd"}> : () -> ()
    %cst_34 = arith.constant dense<0.000000e+00> : vector<2x8x8xf32>
    %103 = tpu.matmul %101, %102, %cst_34 {dimension_numbers = #tpu.dot_dimension_numbers<[2], [1], [1], [2], [0, 0, 0, 1, 1, 2], [0], [0]>} : vector<2x8x8xbf16>, vector<2x8x8xbf16>, vector<2x8x8xf32> -> vector<2x8x8xf32>
    "tpu.trace_stop"() : () -> ()
    %104 = vector.shape_cast %103 : vector<2x8x8xf32> to vector<16x8xf32>
    %c0_35 = arith.constant 0 : index
    %c24 = arith.constant 24 : index
    %105 = vector.load %arg23[%c0_35, %c24] : memref<16x32xf32, #tpu.memory_space<vmem>>, vector<16x8xf32>
    tpu.vector_store %arg23[%c0_35, %c24], %104 {strides = array<i32>} : memref<16x32xf32, #tpu.memory_space<vmem>>, vector<16x8xf32>,
    %c0_36 = arith.constant 0 : index
    %c0_37 = arith.constant 0 : index
    %106 = vector.load %arg23[%c0_36, %c0_37] : memref<16x32xf32, #tpu.memory_space<vmem>>, vector<16x32xf32>
    %107 = arith.truncf %106 : vector<16x32xf32> to vector<16x32xbf16>
    %c0_38 = arith.constant 0 : index
    %c0_39 = arith.constant 0 : index
    %c0_40 = arith.constant 0 : index
    %108 = vector.load %arg7[%c0_38, %c0_39, %c0_40] : memref<1x32x32xbf16, #tpu.memory_space<vmem>>, vector<1x32x32xbf16>
    %109 = vector.shape_cast %108 : vector<1x32x32xbf16> to vector<32x32xbf16>
    %cst_41 = arith.constant dense<0.000000e+00> : vector<16x32xf32>
    %110 = tpu.matmul %107, %109, %cst_41 {dimension_numbers = #tpu.dot_dimension_numbers<[1], [0], [0], [1], [0, 0, 1, 1], [], []>} : vector<16x32xbf16>, vector<32x32xbf16>, vector<16x32xf32> -> vector<16x32xf32>
    %c0_42 = arith.constant 0 : index
    %c0_43 = arith.constant 0 : index
    %c0_44 = arith.constant 0 : index
    %111 = vector.load %arg8[%c0_42, %c0_43, %c0_44] : memref<1x1x32xf32, #tpu.memory_space<vmem>>, vector<1x1x32xf32>
    %112 = vector.shape_cast %111 : vector<1x1x32xf32> to vector<1x32xf32>
    %113 = vector.broadcast %112 : vector<1x32xf32> to vector<16x32xf32>
    %114 = arith.addf %110, %113 : vector<16x32xf32>
    %115 = arith.addf %114, %3 : vector<16x32xf32>
    %c0_45 = arith.constant 0 : index
    %c0_46 = arith.constant 0 : index
    %c0_47 = arith.constant 0 : index
    %116 = vector.load %arg9[%c0_45, %c0_46, %c0_47] : memref<1x1x32xf32, #tpu.memory_space<vmem>>, vector<1x1x32xf32>
    %117 = vector.shape_cast %116 : vector<1x1x32xf32> to vector<1x32xf32>
    %c0_48 = arith.constant 0 : index
    %c0_49 = arith.constant 0 : index
    %c0_50 = arith.constant 0 : index
    %118 = vector.load %arg10[%c0_48, %c0_49, %c0_50] : memref<1x1x32xf32, #tpu.memory_space<vmem>>, vector<1x1x32xf32>
    %119 = vector.shape_cast %118 : vector<1x1x32xf32> to vector<1x32xf32>
    %cst_51 = arith.constant dense<0.000000e+00> : vector<16xf32>
    %120 = vector.multi_reduction <add>, %115, %cst_51 [1] : vector<16x32xf32> to vector<16xf32>
    %121 = vector.shape_cast %120 : vector<16xf32> to vector<16x1xf32>
    %cst_52 = arith.constant 3.200000e+01 : f32
    %122 = vector.broadcast %cst_52 : f32 to vector<16x1xf32>
    %123 = arith.divf %121, %122 : vector<16x1xf32>
    %124 = vector.broadcast %123 : vector<16x1xf32> to vector<16x32xf32>
    %125 = arith.subf %115, %124 : vector<16x32xf32>
    %126 = arith.mulf %125, %125 : vector<16x32xf32>
    %cst_53 = arith.constant dense<0.000000e+00> : vector<16xf32>
    %127 = vector.multi_reduction <add>, %126, %cst_53 [1] : vector<16x32xf32> to vector<16xf32>
    %128 = vector.shape_cast %127 : vector<16xf32> to vector<16x1xf32>
    %cst_54 = arith.constant 3.200000e+01 : f32
    %129 = vector.broadcast %cst_54 : f32 to vector<16x1xf32>
    %130 = arith.divf %128, %129 : vector<16x1xf32>
    %131 = vector.broadcast %123 : vector<16x1xf32> to vector<16x32xf32>
    %132 = arith.subf %115, %131 : vector<16x32xf32>
    %cst_55 = arith.constant 9.99999996E-13 : f32
    %133 = vector.broadcast %cst_55 : f32 to vector<16x1xf32>
    %134 = arith.addf %130, %133 : vector<16x1xf32>
    %135 = math.rsqrt %134 : vector<16x1xf32>
    %136 = vector.broadcast %135 : vector<16x1xf32> to vector<16x32xf32>
    %137 = arith.mulf %132, %136 : vector<16x32xf32>
    %138 = vector.broadcast %117 : vector<1x32xf32> to vector<16x32xf32>
    %139 = arith.mulf %137, %138 : vector<16x32xf32>
    %140 = vector.broadcast %119 : vector<1x32xf32> to vector<16x32xf32>
    %141 = arith.addf %139, %140 : vector<16x32xf32>
    %142 = arith.truncf %141 : vector<16x32xf32> to vector<16x32xbf16>
    %c0_56 = arith.constant 0 : index
    %c0_57 = arith.constant 0 : index
    %c0_58 = arith.constant 0 : index
    %143 = vector.load %arg11[%c0_56, %c0_57, %c0_58] : memref<1x32x64xbf16, #tpu.memory_space<vmem>>, vector<1x32x64xbf16>
    %144 = vector.shape_cast %143 : vector<1x32x64xbf16> to vector<32x64xbf16>
    %cst_59 = arith.constant dense<0.000000e+00> : vector<16x64xf32>
    %145 = tpu.matmul %142, %144, %cst_59 {dimension_numbers = #tpu.dot_dimension_numbers<[1], [0], [0], [1], [0, 0, 1, 1], [], []>} : vector<16x32xbf16>, vector<32x64xbf16>, vector<16x64xf32> -> vector<16x64xf32>
    %c0_60 = arith.constant 0 : index
    %c0_61 = arith.constant 0 : index
    %c0_62 = arith.constant 0 : index
    %146 = vector.load %arg12[%c0_60, %c0_61, %c0_62] : memref<1x1x64xf32, #tpu.memory_space<vmem>>, vector<1x1x64xf32>
    %147 = vector.shape_cast %146 : vector<1x1x64xf32> to vector<1x64xf32>
    %148 = vector.broadcast %147 : vector<1x64xf32> to vector<16x64xf32>
    %149 = arith.addf %145, %148 : vector<16x64xf32>
    %150 = arith.mulf %149, %149 : vector<16x64xf32>
    %151 = arith.mulf %149, %150 : vector<16x64xf32>
    %cst_63 = arith.constant 4.471500e-02 : f32
    %152 = vector.broadcast %cst_63 : f32 to vector<16x64xf32>
    %153 = arith.mulf %152, %151 : vector<16x64xf32>
    %154 = arith.addf %149, %153 : vector<16x64xf32>
    %cst_64 = arith.constant 0.797884583 : f32
    %155 = vector.broadcast %cst_64 : f32 to vector<16x64xf32>
    %156 = arith.mulf %155, %154 : vector<16x64xf32>
    %157 = math.tanh %156 : vector<16x64xf32>
    %cst_65 = arith.constant 1.000000e+00 : f32
    %158 = vector.broadcast %cst_65 : f32 to vector<16x64xf32>
    %159 = arith.addf %158, %157 : vector<16x64xf32>
    %cst_66 = arith.constant 5.000000e-01 : f32
    %160 = vector.broadcast %cst_66 : f32 to vector<16x64xf32>
    %161 = arith.mulf %160, %159 : vector<16x64xf32>
    %162 = arith.mulf %149, %161 : vector<16x64xf32>
    %163 = arith.truncf %162 : vector<16x64xf32> to vector<16x64xbf16>
    %c0_67 = arith.constant 0 : index
    %c0_68 = arith.constant 0 : index
    %c0_69 = arith.constant 0 : index
    %164 = vector.load %arg13[%c0_67, %c0_68, %c0_69] : memref<1x64x32xbf16, #tpu.memory_space<vmem>>, vector<1x64x32xbf16>
    %165 = vector.shape_cast %164 : vector<1x64x32xbf16> to vector<64x32xbf16>
    %cst_70 = arith.constant dense<0.000000e+00> : vector<16x32xf32>
    %166 = tpu.matmul %163, %165, %cst_70 {dimension_numbers = #tpu.dot_dimension_numbers<[1], [0], [0], [1], [0, 0, 1, 1], [], []>} : vector<16x64xbf16>, vector<64x32xbf16>, vector<16x32xf32> -> vector<16x32xf32>
    %c0_71 = arith.constant 0 : index
    %c0_72 = arith.constant 0 : index
    %c0_73 = arith.constant 0 : index
    %167 = vector.load %arg14[%c0_71, %c0_72, %c0_73] : memref<1x1x32xf32, #tpu.memory_space<vmem>>, vector<1x1x32xf32>
    %168 = vector.shape_cast %167 : vector<1x1x32xf32> to vector<1x32xf32>
    %169 = vector.broadcast %168 : vector<1x32xf32> to vector<16x32xf32>
    %170 = arith.addf %166, %169 : vector<16x32xf32>
    %171 = arith.addf %170, %141 : vector<16x32xf32>
    %c0_74 = arith.constant 0 : index
    %c0_75 = arith.constant 0 : index
    %c0_76 = arith.constant 0 : index
    %172 = vector.load %arg15[%c0_74, %c0_75, %c0_76] : memref<1x1x32xf32, #tpu.memory_space<vmem>>, vector<1x1x32xf32>
    %173 = vector.shape_cast %172 : vector<1x1x32xf32> to vector<1x32xf32>
    %c0_77 = arith.constant 0 : index
    %c0_78 = arith.constant 0 : index
    %c0_79 = arith.constant 0 : index
    %174 = vector.load %arg16[%c0_77, %c0_78, %c0_79] : memref<1x1x32xf32, #tpu.memory_space<vmem>>, vector<1x1x32xf32>
    %175 = vector.shape_cast %174 : vector<1x1x32xf32> to vector<1x32xf32>
    %cst_80 = arith.constant dense<0.000000e+00> : vector<16xf32>
    %176 = vector.multi_reduction <add>, %171, %cst_80 [1] : vector<16x32xf32> to vector<16xf32>
    %177 = vector.shape_cast %176 : vector<16xf32> to vector<16x1xf32>
    %cst_81 = arith.constant 3.200000e+01 : f32
    %178 = vector.broadcast %cst_81 : f32 to vector<16x1xf32>
    %179 = arith.divf %177, %178 : vector<16x1xf32>
    %180 = vector.broadcast %179 : vector<16x1xf32> to vector<16x32xf32>
    %181 = arith.subf %171, %180 : vector<16x32xf32>
    %182 = arith.mulf %181, %181 : vector<16x32xf32>
    %cst_82 = arith.constant dense<0.000000e+00> : vector<16xf32>
    %183 = vector.multi_reduction <add>, %182, %cst_82 [1] : vector<16x32xf32> to vector<16xf32>
    %184 = vector.shape_cast %183 : vector<16xf32> to vector<16x1xf32>
    %cst_83 = arith.constant 3.200000e+01 : f32
    %185 = vector.broadcast %cst_83 : f32 to vector<16x1xf32>
    %186 = arith.divf %184, %185 : vector<16x1xf32>
    %187 = vector.broadcast %179 : vector<16x1xf32> to vector<16x32xf32>
    %188 = arith.subf %171, %187 : vector<16x32xf32>
    %cst_84 = arith.constant 9.99999996E-13 : f32
    %189 = vector.broadcast %cst_84 : f32 to vector<16x1xf32>
    %190 = arith.addf %186, %189 : vector<16x1xf32>
    %191 = math.rsqrt %190 : vector<16x1xf32>
    %192 = vector.broadcast %191 : vector<16x1xf32> to vector<16x32xf32>
    %193 = arith.mulf %188, %192 : vector<16x32xf32>
    %194 = vector.broadcast %173 : vector<1x32xf32> to vector<16x32xf32>
    %195 = arith.mulf %193, %194 : vector<16x32xf32>
    %196 = vector.broadcast %175 : vector<1x32xf32> to vector<16x32xf32>
    %197 = arith.addf %195, %196 : vector<16x32xf32>
    %c0_85 = arith.constant 0 : index
    %c0_86 = arith.constant 0 : index
    %198 = vector.load %arg22[%c0_85, %c0_86] : memref<16x32xf32, #tpu.memory_space<vmem>>, vector<16x32xf32>
    tpu.vector_store %arg22[%c0_85, %c0_86], %197 {strides = array<i32>} : memref<16x32xf32, #tpu.memory_space<vmem>>, vector<16x32xf32>,
    %c1_i32 = arith.constant 1 : i32
    %199 = arith.cmpi eq, %arg0, %c1_i32 : i32
    %200 = arith.extui %199 : i1 to i32
    %c0_i32_87 = arith.constant 0 : i32
    %201 = arith.cmpi ne, %200, %c0_i32_87 : i32
    scf.if %201 {
      %c0_88 = arith.constant 0 : index
      %c0_89 = arith.constant 0 : index
      %202 = tpu.strided_load %arg22[%c0_88, %c0_89] {strides = array<i32: 8, 1>} : memref<16x32xf32, #tpu.memory_space<vmem>>, vector<2x32xf32>
      %203 = arith.truncf %202 : vector<2x32xf32> to vector<2x32xbf16>
      %c0_90 = arith.constant 0 : index
      %c0_91 = arith.constant 0 : index
      %204 = vector.load %arg17[%c0_90, %c0_91] : memref<32x32xbf16, #tpu.memory_space<vmem>>, vector<32x32xbf16>
      %cst_92 = arith.constant dense<0.000000e+00> : vector<2x32xf32>
      %205 = tpu.matmul %203, %204, %cst_92 {dimension_numbers = #tpu.dot_dimension_numbers<[1], [0], [0], [1], [0, 0, 1, 1], [], []>} : vector<2x32xbf16>, vector<32x32xbf16>, vector<2x32xf32> -> vector<2x32xf32>
      %c0_93 = arith.constant 0 : index
      %c0_94 = arith.constant 0 : index
      %206 = vector.load %arg18[%c0_93, %c0_94] : memref<1x32xf32, #tpu.memory_space<vmem>>, vector<1x32xf32>
      %207 = vector.broadcast %206 : vector<1x32xf32> to vector<2x32xf32>
      %208 = arith.addf %205, %207 : vector<2x32xf32>
      %209 = math.tanh %208 : vector<2x32xf32>
      %210 = arith.truncf %209 : vector<2x32xf32> to vector<2x32xbf16>
      %c0_95 = arith.constant 0 : index
      %c0_96 = arith.constant 0 : index
      %211 = vector.load %arg19[%c0_95, %c0_96] : memref<32x128xbf16, #tpu.memory_space<vmem>>, vector<32x128xbf16>
      %cst_97 = arith.constant dense<0.000000e+00> : vector<2x128xf32>
      %212 = tpu.matmul %210, %211, %cst_97 {dimension_numbers = #tpu.dot_dimension_numbers<[1], [0], [0], [1], [0, 0, 1, 1], [], []>} : vector<2x32xbf16>, vector<32x128xbf16>, vector<2x128xf32> -> vector<2x128xf32>
      %c0_98 = arith.constant 0 : index
      %c0_99 = arith.constant 0 : index
      %213 = vector.load %arg20[%c0_98, %c0_99] : memref<1x128xf32, #tpu.memory_space<vmem>>, vector<1x128xf32>
      %214 = vector.broadcast %213 : vector<1x128xf32> to vector<2x128xf32>
      %215 = arith.addf %212, %214 : vector<2x128xf32>
      %c0_100 = arith.constant 0 : index
      %c0_101 = arith.constant 0 : index
      %216 = vector.load %arg21[%c0_100, %c0_101] : memref<2x128xf32, #tpu.memory_space<vmem>>, vector<2x128xf32>
      tpu.vector_store %arg21[%c0_100, %c0_101], %215 {strides = array<i32>} : memref<2x128xf32, #tpu.memory_space<vmem>>, vector<2x128xf32>,
    } else {
    }
    return
  }
  func.func @transform_0(%arg0: i32) -> (i32, i32) {
    %c0_i32 = arith.constant 0 : i32
    %c0_i32_0 = arith.constant 0 : i32
    %c0_i32_1 = arith.constant 0 : i32
    return %c0_i32, %c0_i32_0 : i32, i32
  }
  func.func @transform_1(%arg0: i32) -> (i32, i32, i32) {
    %c0_i32 = arith.constant 0 : i32
    %c0_i32_0 = arith.constant 0 : i32
    %c0_i32_1 = arith.constant 0 : i32
    %c0_i32_2 = arith.constant 0 : i32
    return %c0_i32, %c0_i32_0, %c0_i32_1 : i32, i32, i32
  }
  func.func @transform_2(%arg0: i32) -> (i32, i32) {
    %c0_i32 = arith.constant 0 : i32
    %c0_i32_0 = arith.constant 0 : i32
    %c0_i32_1 = arith.constant 0 : i32
    return %c0_i32, %c0_i32_0 : i32, i32
  }
  func.func @transform_3(%arg0: i32) -> (i32, i32) {
    %c0_i32 = arith.constant 0 : i32
    %c0_i32_0 = arith.constant 0 : i32
    %c0_i32_1 = arith.constant 0 : i32
    return %c0_i32, %c0_i32_0 : i32, i32
  }
  func.func @transform_4(%arg0: i32) -> (i32, i32, i32) {
    %c0_i32 = arith.constant 0 : i32
    %c0_i32_0 = arith.constant 0 : i32
    %c0_i32_1 = arith.constant 0 : i32
    return %arg0, %c0_i32, %c0_i32_0 : i32, i32, i32
  }
  func.func @transform_5(%arg0: i32) -> (i32, i32, i32) {
    %c0_i32 = arith.constant 0 : i32
    %c0_i32_0 = arith.constant 0 : i32
    %c0_i32_1 = arith.constant 0 : i32
    return %arg0, %c0_i32, %c0_i32_0 : i32, i32, i32
  }
  func.func @transform_6(%arg0: i32) -> (i32, i32, i32) {
    %c0_i32 = arith.constant 0 : i32
    %c0_i32_0 = arith.constant 0 : i32
    %c0_i32_1 = arith.constant 0 : i32
    return %arg0, %c0_i32, %c0_i32_0 : i32, i32, i32
  }
  func.func @transform_7(%arg0: i32) -> (i32, i32, i32) {
    %c0_i32 = arith.constant 0 : i32
    %c0_i32_0 = arith.constant 0 : i32
    %c0_i32_1 = arith.constant 0 : i32
    return %arg0, %c0_i32, %c0_i32_0 : i32, i32, i32
  }
  func.func @transform_8(%arg0: i32) -> (i32, i32, i32) {
    %c0_i32 = arith.constant 0 : i32
    %c0_i32_0 = arith.constant 0 : i32
    %c0_i32_1 = arith.constant 0 : i32
    return %arg0, %c0_i32, %c0_i32_0 : i32, i32, i32
  }
  func.func @transform_9(%arg0: i32) -> (i32, i32, i32) {
    %c0_i32 = arith.constant 0 : i32
    %c0_i32_0 = arith.constant 0 : i32
    %c0_i32_1 = arith.constant 0 : i32
    return %arg0, %c0_i32, %c0_i32_0 : i32, i32, i32
  }
  func.func @transform_10(%arg0: i32) -> (i32, i32, i32) {
    %c0_i32 = arith.constant 0 : i32
    %c0_i32_0 = arith.constant 0 : i32
    %c0_i32_1 = arith.constant 0 : i32
    return %arg0, %c0_i32, %c0_i32_0 : i32, i32, i32
  }
  func.func @transform_11(%arg0: i32) -> (i32, i32, i32) {
    %c0_i32 = arith.constant 0 : i32
    %c0_i32_0 = arith.constant 0 : i32
    %c0_i32_1 = arith.constant 0 : i32
    return %arg0, %c0_i32, %c0_i32_0 : i32, i32, i32
  }
  func.func @transform_12(%arg0: i32) -> (i32, i32, i32) {
    %c0_i32 = arith.constant 0 : i32
    %c0_i32_0 = arith.constant 0 : i32
    %c0_i32_1 = arith.constant 0 : i32
    return %arg0, %c0_i32, %c0_i32_0 : i32, i32, i32
  }
  func.func @transform_13(%arg0: i32) -> (i32, i32, i32) {
    %c0_i32 = arith.constant 0 : i32
    %c0_i32_0 = arith.constant 0 : i32
    %c0_i32_1 = arith.constant 0 : i32
    return %arg0, %c0_i32, %c0_i32_0 : i32, i32, i32
  }
  func.func @transform_14(%arg0: i32) -> (i32, i32, i32) {
    %c0_i32 = arith.constant 0 : i32
    %c0_i32_0 = arith.constant 0 : i32
    %c0_i32_1 = arith.constant 0 : i32
    return %arg0, %c0_i32, %c0_i32_0 : i32, i32, i32
  }
  func.func @transform_15(%arg0: i32) -> (i32, i32, i32) {
    %c0_i32 = arith.constant 0 : i32
    %c0_i32_0 = arith.constant 0 : i32
    %c0_i32_1 = arith.constant 0 : i32
    return %arg0, %c0_i32, %c0_i32_0 : i32, i32, i32
  }
  func.func @transform_16(%arg0: i32) -> (i32, i32) {
    %c0_i32 = arith.constant 0 : i32
    %c0_i32_0 = arith.constant 0 : i32
    %c0_i32_1 = arith.constant 0 : i32
    return %c0_i32, %c0_i32_0 : i32, i32
  }
  func.func @transform_17(%arg0: i32) -> (i32, i32) {
    %c0_i32 = arith.constant 0 : i32
    %c0_i32_0 = arith.constant 0 : i32
    %c0_i32_1 = arith.constant 0 : i32
    return %c0_i32, %c0_i32_0 : i32, i32
  }
  func.func @transform_18(%arg0: i32) -> (i32, i32) {
    %c0_i32 = arith.constant 0 : i32
    %c0_i32_0 = arith.constant 0 : i32
    %c0_i32_1 = arith.constant 0 : i32
    return %c0_i32, %c0_i32_0 : i32, i32
  }
  func.func @transform_19(%arg0: i32) -> (i32, i32) {
    %c0_i32 = arith.constant 0 : i32
    %c0_i32_0 = arith.constant 0 : i32
    %c0_i32_1 = arith.constant 0 : i32
    return %c0_i32, %c0_i32_0 : i32, i32
  }
  func.func @transform_20(%arg0: i32) -> (i32, i32) {
    %c0_i32 = arith.constant 0 : i32
    %c0_i32_0 = arith.constant 0 : i32
    %c0_i32_1 = arith.constant 0 : i32
    return %c0_i32, %c0_i32_0 : i32, i32
  }
}

</mosaic_0001>

<bundles_post_ra>
// kernel: tpu_custom_call.1
= control target key start
LH: loop header
LB: loop body
LE: loop exit
PB: predicated region body
PF: predicated region fallthrough
CT: control target
= control target key end

     0   :  { %s4491_s0 = inlined_call_operand.hbm [shape: f32[16,32], index: 0, kind: input, shape index: {}]   ;;  %s4492_s1 = inlined_call_operand.hbm [shape: f32[2,1,8], index: 1, kind: input, shape index: {}]   ;;  %s4493_s2 = inlined_call_operand.hbm [shape: f32[1,32], index: 2, kind: input, shape index: {}]   ;;  %s4494_s3 = inlined_call_operand.hbm [shape: f32[1,32], index: 3, kind: input, shape index: {}]   ;;  %s4495_s4 = inlined_call_operand.vmem [shape: bf16[2,32,96], index: 4, kind: input, shape index: {}]   ;;  %s4496_s5 = inlined_call_operand.hbm [shape: f32[2,1,96], index: 5, kind: input, shape index: {}]   ;;  %s4497_s6 = inlined_call_operand.vmem [shape: bf16[2,32,32], index: 6, kind: input, shape index: {}]   ;;  %s4498_s7 = inlined_call_operand.hbm [shape: f32[2,1,32], index: 7, kind: input, shape index: {}]   ;;  %s4499_s8 = inlined_call_operand.hbm [shape: f32[2,1,32], index: 8, kind: input, shape index: {}]   ;;  %s4500_s9 = inlined_call_operand.hbm [shape: f32[2,1,32], index: 9, kind: input, shape index: {}]   ;;  %s4501_s10 = inlined_call_operand.vmem [shape: bf16[2,32,64], index: 10, kind: input, shape index: {}]   ;;  %s4502_s11 = inlined_call_operand.hbm [shape: f32[2,1,64], index: 11, kind: input, shape index: {}]   ;;  %s4503_s12 = inlined_call_operand.vmem [shape: bf16[2,64,32], index: 12, kind: input, shape index: {}]   ;;  %s4504_s13 = inlined_call_operand.hbm [shape: f32[2,1,32], index: 13, kind: input, shape index: {}]   ;;  %s4505_s14 = inlined_call_operand.hbm [shape: f32[2,1,32], index: 14, kind: input, shape index: {}]   ;;  %s4506_s15 = inlined_call_operand.hbm [shape: f32[2,1,32], index: 15, kind: input, shape index: {}]   ;;  %s4507_s16 = inlined_call_operand.vmem [shape: bf16[32,32], index: 16, kind: input, shape index: {}]   ;;  %s4508_s17 = inlined_call_operand.hbm [shape: f32[1,32], index: 17, kind: input, shape index: {}]   ;;  %s4509_s18 = inlined_call_operand.vmem [shape: bf16[32,128], index: 18, kind: input, shape index: {}]   ;;  %s4510_s19 = inlined_call_operand.vmem [shape: f32[1,128], index: 19, kind: input, shape index: {}]   ;;  %s4511_s20 = inlined_call_operand.hbm [shape: f32[2,128], index: 20, kind: output, shape index: {}]  }
   0x1   :  { %4531 = sst [smem:[#allocation33_spill]] %s4491_s0 }
   0x2   :  { %4532 = sst [smem:[#allocation34_spill]] %s4492_s1 }
   0x3   :  { %4533 = sst [smem:[#allocation35_spill]] %s4493_s2 }
   0x4   :  { %4534 = sst [smem:[#allocation36_spill]] %s4494_s3 }
   0x5   :  { %4535 = sst [smem:[#allocation37_spill]] %s4495_s4 }
   0x6   :  { %4536 = sst [smem:[#allocation38_spill]] %s4496_s5 }
   0x7   :  { %4537 = sst [smem:[#allocation39_spill]] %s4497_s6 }
   0x8   :  { %4538 = sst [smem:[#allocation40_spill]] %s4501_s10 }
   0x9   :  { %4539 = sst [smem:[#allocation41_spill]] %s4503_s12 }
   0xa   :  { %4540 = sst [smem:[#allocation42_spill]] %s4507_s16 }
   0xb   :  { %4541 = sst [smem:[#allocation43_spill]] %s4509_s18 }
   0xc   :  { %4542 = sst [smem:[#allocation44_spill]] %s4510_s19 }
   0xd   :  { %4543 = sst [smem:[#allocation45_spill]] %s4511_s20 }
   0xe   :  { %25 = vsyncpa [#allocation5], 0 }
   0xf   :  { %26 = vsyncpa [#allocation8], 0 }
  0x10   :  { %27 = vsyncpa [#allocation11], 0 }
  0x11   :  { %28 = vsyncpa [#allocation6], 0  ;;  %s3892_s1 = smov 0   ;;  %s3894_s22 = smov 0  }
  0x12   :  { %s3896_s23 = smov 0   ;;  %s3898_s24 = smov 0  }
  0x13 LB: > { %4544 = sst [smem:[#allocation28_spill]] %s3741_s22  ;;  %s3911_s2 = sadd.s32 4294967295, %s3749_s24   ;;  %s3749_s24 = sphi %s3898_s24, %s4597_s24   ;;  %s3745_s23 = sphi %s3896_s23, %s4600_s23   ;;  %s3741_s22 = sphi %s3894_s22, %s4599_s22   ;;  %s3737_s1 = sphi %s3892_s1, %s4598_s1  }
  0x14   : > { %4545 = sst [smem:[#allocation29_spill]] %s3745_s23  ;;  %s3914_s25 = sadd.s32 1, %s3749_s24  }
  0x15   : > { %4546 = sst [smem:[#allocation30_spill]] %s3914_s25  ;;  %s148_s3 = ssub.s32 %s3749_s24, %s3914_s25 }
  0x16   : > { %s151_s26 = sadd.s32 1, %s3745_s23  ;;  %p149_p0 = scmp.eq.s32.totalorder %s148_s3, 0 }
  0x17   : > { %p158_p1 = scmp.ne.s32.totalorder %s3745_s23, %s3741_s22  ;;  %p159_p2 = scmp.eq.s32.totalorder %s3749_s24, 0 }
  0x18   : > { %p164_p3 = scmp.ne.s32.totalorder %s3741_s22, %s3737_s1  ;;  %p4512_p5 = scmp.eq.s32.totalorder %s3911_s2, 0 }
  0x19   : > { %s3924_s27 = scalar_select %p149_p0, %s3745_s23, %s151_s26  }
  0x1a   : > { %p3926_p4 = por %p159_p2, %p158_p1  ;;  %p2810_p6 = scmp.ge.s32.totalorder %s3749_s24, 1 }
  0x1b   : > { %4547 = sst [smem:[#allocation31_spill]] %s3924_s27  ;;  %p540_p7 = scmp.lt.s32.totalorder %s3749_s24, 3 }
  0x1c   : > { %p3935_p8 = por %p4512_p5, %p164_p3  ;;  %s3751_s30 = smov [#allocation4]  }
  0x1d   : > { %p3940_p10 = pnand %p2810_p6, %p540_p7  ;;  %s552_s0 = sshll.u32 %s3751_s30, 4  ;;  %s553_s0 = int_to_ptr.vmem [resolvable:$true] %s552_s0 }
  0x1e   : > { %s4549_s4 = scalar_select %p3935_p8, 1, 0 }
  0x1f   : > { %s4551_s29 = scalar_select %p3940_p10, 1, 0 }
  0x20   : > { %4550 = sst [smem:[#allocation32_spill]] %s4549_s4  ;;  %p3139_p11 = pneg %p3940_p10 }
  0x21   : > { %p3185_p13 = scmp.lt.s32.totalorder %s3749_s24, 2  ;;  %s629_s1 = sand.u32 1, %s3749_s24  }
  0x22   : > { %p3948_p12 = pnand %p3139_p11, %p4512_p5  ;;  %s3955_s3 = sand.u32 1, %s3745_s23  }
  0x23   : > { %p3959_p0 = pnand %p3185_p13, %p3926_p4  ;;  %s3328_s27 = scalar_lea.vmem %s553_s0, 256 }
  0x24   : > { %s4552_s21 = scalar_select %p3948_p12, 1, 0 }
  0x25   : > { %s4553_s26 = scalar_select %p3959_p0, 1, 0 }
  0x26   : > { %p3965_p1 = pneg %p3948_p12  ;;  %p3329_p2 = scmp.ne.s32.totalorder %s553_s0, %s3328_s27 }
  0x27   : > { %p3336_p7 = scmp.lt.s32.totalorder %s553_s0, %s553_s0  ;;  %p3337_p11 = scmp.lt.s32.totalorder %s3328_s27, %s3328_s27 }
  0x28   : > { %s4554_s30 = scalar_select %p3965_p1, 1, 0 }
  0x29   : > { %p3331_p3 = pnand %p3329_p2, %p3965_p1  ;;  %p3338_p9 = por %p3337_p11, %p3336_p7 }
  0x2b   : > { %p3332_p6 = pneg %p3331_p3 }
  0x2d   : > { %p3339_p5 = pnand %p3338_p9, %p3332_p6 }
  0x2f   : > { %3342 = shalt.err (!%p3339_p5)
}
  0x30   : > { %s3752_s28 = smov 128   ;;  %s3753_s23 = smov 8  }
  0x31   : > { %s4555_s19 = sld [smem:[#allocation33_spill]]  ;;  %s3977_s18 = sshll.u32 %s3749_s24, 4 }
  0x32   : > { %s4556_s5 = sld [smem:[#allocation38_spill]]  ;;  %s632_s10 = scalar_lea.vmem [#allocation12], %s3955_s3 }
  0x33   : > { %s639_s6 = sshll.u32 %s632_s10, 4  ;;  %s3986_s4 = scalar_lea.sflag [#allocation5], %s629_s1  ;;  %s640_s6 = int_to_ptr.vmem [resolvable:$true] %s639_s6 }
  0x34   : > { %p3992_p5 = pneg %p3959_p0 }
  0x37   : > { %3142 = dma.hbm_to_vmem [thread:$0]  (!%p3948_p12), %s4555_s19, 256, %s553_s0, [#allocation5], %s3752_s28, %s3752_s28, %s3753_s23  }
  0x38   : > { %s3983_s27 = scalar_lea.hbm %s4556_s5, %s3977_s18  ;;  %s3348_s20 = scalar_lea.hbm %s4556_s5, 32 }
  0x39   : > { %s3343_s22 = scalar_lea.hbm %s3983_s27, 16  ;;  %p3349_p2 = scmp.lt.s32.totalorder %s3983_s27, %s4556_s5 }
  0x3a   : > { %p3344_p4 = scmp.ne.s32.totalorder %s3983_s27, %s3343_s22  ;;  %p3350_p3 = scmp.lt.s32.totalorder %s3348_s20, %s3343_s22 }
  0x3b   : > { %s4557_s19 = scalar_select %p3992_p5, 1, 0 }
  0x3c   : > { %p3346_p9 = pnand %p3992_p5, %p3344_p4  ;;  %p3351_p6 = por %p3350_p3, %p3349_p2 }
  0x3e   : > { %p3347_p13 = pneg %p3346_p9 }
  0x40   : > { %p3352_p7 = pnand %p3351_p6, %p3347_p13 }
  0x42   : > { %3355 = shalt.err (!%p3352_p7)
}
  0x43   : > { %s3356_s24 = scalar_lea.vmem %s640_s6, 16  ;;  %s3754_s25 = smov [#allocation12]  }
  0x44   : > { %p3357_p11 = scmp.ne.s32.totalorder %s640_s6, %s3356_s24  ;;  %s3361_s0 = sshll.u32 %s3754_s25, 4  ;;  %s3362_s0 = int_to_ptr.vmem [resolvable:$false] %s3361_s0 }
  0x45   : > { %s3363_s1 = scalar_lea.vmem %s3362_s0, 32  ;;  %p3364_p4 = scmp.lt.s32.totalorder %s640_s6, %s3362_s0 }
  0x46   : > { %p3359_p8 = pnand %p3357_p11, %p3992_p5  ;;  %p3365_p9 = scmp.lt.s32.totalorder %s3363_s1, %s3356_s24 }
  0x48   : > { %p3360_p10 = pneg %p3359_p8  ;;  %p3366_p12 = por %p3365_p9, %p3364_p4 }
  0x4a   : > { %p3367_p1 = pnand %p3366_p12, %p3360_p10 }
  0x4c   : > { %3370 = shalt.err (!%p3367_p1)
}
  0x4d   : > { %3158 = dma.hbm_to_vmem [thread:$0]  (!%p3959_p0), %s3983_s27, 16, %s640_s6, %s3986_s4  }
  0x4e   : > { %s662_s12 = scalar_lea.hbm %s4498_s7, %s3977_s18  ;;  %s657_s16 = scalar_lea.vmem [#allocation13], %s3955_s3 }
  0x4f   : > { %s664_s20 = sshll.u32 %s657_s16, 4  ;;  %s3371_s23 = scalar_lea.hbm %s662_s12, 16  ;;  %s665_s20 = int_to_ptr.vmem [resolvable:$true] %s664_s20 }
  0x50   : > { %p3372_p8 = scmp.ne.s32.totalorder %s662_s12, %s3371_s23  ;;  %s3376_s25 = scalar_lea.hbm %s4498_s7, 32 }
  0x51   : > { %p3377_p1 = scmp.lt.s32.totalorder %s662_s12, %s4498_s7  ;;  %p3378_p13 = scmp.lt.s32.totalorder %s3376_s25, %s3371_s23 }
  0x52   : > { %p3374_p10 = pnand %p3372_p8, %p3992_p5 }
  0x53   : > { %p3379_p2 = por %p3378_p13, %p3377_p1 }
  0x54   : > { %p3375_p12 = pneg %p3374_p10 }
  0x56   : > { %p3380_p3 = pnand %p3379_p2, %p3375_p12 }
  0x58   : > { %3383 = shalt.err (!%p3380_p3)
}
  0x59   : > { %s3384_s6 = scalar_lea.vmem %s665_s20, 16  ;;  %s3755_s27 = smov [#allocation13]  }
  0x5a   : > { %p3385_p6 = scmp.ne.s32.totalorder %s665_s20, %s3384_s6  ;;  %s3389_s22 = sshll.u32 %s3755_s27, 4  ;;  %s3390_s22 = int_to_ptr.vmem [resolvable:$false] %s3389_s22 }
  0x5b   : > { %s3391_s28 = scalar_lea.vmem %s3390_s22, 32  ;;  %p3392_p4 = scmp.lt.s32.totalorder %s665_s20, %s3390_s22 }
  0x5c   : > { %p3387_p7 = pnand %p3385_p6, %p3992_p5  ;;  %p3393_p9 = scmp.lt.s32.totalorder %s3391_s28, %s3384_s6 }
  0x5e   : > { %p3388_p11 = pneg %p3387_p7  ;;  %p3394_p8 = por %p3393_p9, %p3392_p4 }
  0x60   : > { %p3395_p10 = pnand %p3394_p8, %p3388_p11 }
  0x62   : > { %3398 = shalt.err (!%p3395_p10)
}
  0x63   : > { %3161 = dma.hbm_to_vmem [thread:$0]  (!%p3959_p0), %s662_s12, 16, %s665_s20, %s3986_s4  }
  0x64   : > { %s679_s10 = scalar_lea.hbm %s4499_s8, %s3977_s18  ;;  %s674_s24 = scalar_lea.vmem [#allocation14], %s3955_s3 }
  0x65   : > { %s681_s25 = sshll.u32 %s674_s24, 4  ;;  %s3399_s0 = scalar_lea.hbm %s679_s10, 16  ;;  %s682_s25 = int_to_ptr.vmem [resolvable:$true] %s681_s25 }
  0x66   : > { %p3400_p12 = scmp.ne.s32.totalorder %s679_s10, %s3399_s0  ;;  %s3404_s27 = scalar_lea.hbm %s4499_s8, 32 }
  0x67   : > { %p3405_p2 = scmp.lt.s32.totalorder %s679_s10, %s4499_s8  ;;  %p3406_p3 = scmp.lt.s32.totalorder %s3404_s27, %s3399_s0 }
  0x68   : > { %p3402_p1 = pnand %p3400_p12, %p3992_p5 }
  0x69   : > { %p3407_p6 = por %p3406_p3, %p3405_p2 }
  0x6a   : > { %p3403_p13 = pneg %p3402_p1 }
  0x6c   : > { %p3408_p7 = pnand %p3407_p6, %p3403_p13 }
  0x6e   : > { %3411 = shalt.err (!%p3408_p7)
}
  0x6f   : > { %s3412_s12 = scalar_lea.vmem %s682_s25, 16  ;;  %s3756_s20 = smov [#allocation14]  }
  0x70   : > { %p3413_p11 = scmp.ne.s32.totalorder %s682_s25, %s3412_s12  ;;  %s3417_s16 = sshll.u32 %s3756_s20, 4  ;;  %s3418_s16 = int_to_ptr.vmem [resolvable:$false] %s3417_s16 }
  0x71   : > { %s3419_s23 = scalar_lea.vmem %s3418_s16, 32  ;;  %p3420_p8 = scmp.lt.s32.totalorder %s682_s25, %s3418_s16 }
  0x72   : > { %p3415_p4 = pnand %p3413_p11, %p3992_p5  ;;  %p3421_p10 = scmp.lt.s32.totalorder %s3419_s23, %s3412_s12 }
  0x74   : > { %p3416_p9 = pneg %p3415_p4  ;;  %p3422_p12 = por %p3421_p10, %p3420_p8 }
  0x76   : > { %p3423_p1 = pnand %p3422_p12, %p3416_p9 }
  0x78   : > { %3426 = shalt.err (!%p3423_p1)
}
  0x79   : > { %3164 = dma.hbm_to_vmem [thread:$0]  (!%p3959_p0), %s679_s10, 16, %s682_s25, %s3986_s4  }
  0x7a   : > { %s696_s1 = scalar_lea.hbm %s4500_s9, %s3977_s18  ;;  %s691_s6 = scalar_lea.vmem [#allocation15], %s3955_s3 }
  0x7b   : > { %s698_s27 = sshll.u32 %s691_s6, 4  ;;  %s3427_s22 = scalar_lea.hbm %s696_s1, 16  ;;  %s699_s27 = int_to_ptr.vmem [resolvable:$true] %s698_s27 }
  0x7c   : > { %p3428_p13 = scmp.ne.s32.totalorder %s696_s1, %s3427_s22  ;;  %s3432_s20 = scalar_lea.hbm %s4500_s9, 32 }
  0x7d   : > { %p3433_p6 = scmp.lt.s32.totalorder %s696_s1, %s4500_s9  ;;  %p3434_p7 = scmp.lt.s32.totalorder %s3432_s20, %s3427_s22 }
  0x7e   : > { %p3430_p2 = pnand %p3428_p13, %p3992_p5 }
  0x7f   : > { %p3435_p11 = por %p3434_p7, %p3433_p6 }
  0x80   : > { %p3431_p3 = pneg %p3430_p2 }
  0x82   : > { %p3436_p4 = pnand %p3435_p11, %p3431_p3 }
  0x84   : > { %3439 = shalt.err (!%p3436_p4)
}
  0x85   : > { %s3440_s10 = scalar_lea.vmem %s699_s27, 16  ;;  %s3757_s25 = smov [#allocation15]  }
  0x86   : > { %p3441_p9 = scmp.ne.s32.totalorder %s699_s27, %s3440_s10  ;;  %s3445_s24 = sshll.u32 %s3757_s25, 4  ;;  %s3446_s24 = int_to_ptr.vmem [resolvable:$false] %s3445_s24 }
  0x87   : > { %s3447_s0 = scalar_lea.vmem %s3446_s24, 32  ;;  %p3448_p12 = scmp.lt.s32.totalorder %s699_s27, %s3446_s24 }
  0x88   : > { %p3443_p8 = pnand %p3441_p9, %p3992_p5  ;;  %p3449_p1 = scmp.lt.s32.totalorder %s3447_s0, %s3440_s10 }
  0x8a   : > { %p3444_p10 = pneg %p3443_p8  ;;  %p3450_p13 = por %p3449_p1, %p3448_p12 }
  0x8c   : > { %p3451_p2 = pnand %p3450_p13, %p3444_p10 }
  0x8e   : > { %3454 = shalt.err (!%p3451_p2)
}
  0x8f   : > { %3167 = dma.hbm_to_vmem [thread:$0]  (!%p3959_p0), %s696_s1, 16, %s699_s27, %s3986_s4  }
  0x90   : > { %s721_s28 = scalar_lea.hbm %s4502_s11, %s3977_s18  ;;  %s716_s12 = scalar_lea.vmem [#allocation16], %s3955_s3 }
  0x91   : > { %s723_s20 = sshll.u32 %s716_s12, 4  ;;  %s3455_s16 = scalar_lea.hbm %s721_s28, 16  ;;  %s724_s20 = int_to_ptr.vmem [resolvable:$true] %s723_s20 }
  0x92   : > { %p3456_p3 = scmp.ne.s32.totalorder %s721_s28, %s3455_s16  ;;  %s3460_s25 = scalar_lea.hbm %s4502_s11, 32 }
  0x93   : > { %p3461_p11 = scmp.lt.s32.totalorder %s721_s28, %s4502_s11  ;;  %p3462_p4 = scmp.lt.s32.totalorder %s3460_s25, %s3455_s16 }
  0x94   : > { %p3458_p6 = pnand %p3456_p3, %p3992_p5 }
  0x95   : > { %p3463_p9 = por %p3462_p4, %p3461_p11 }
  0x96   : > { %p3459_p7 = pneg %p3458_p6 }
  0x98   : > { %p3464_p8 = pnand %p3463_p9, %p3459_p7 }
  0x9a   : > { %3467 = shalt.err (!%p3464_p8)
}
  0x9b   : > { %s3468_s1 = scalar_lea.vmem %s724_s20, 16  ;;  %s3758_s27 = smov [#allocation16]  }
  0x9c   : > { %p3469_p10 = scmp.ne.s32.totalorder %s724_s20, %s3468_s1  ;;  %s3473_s6 = sshll.u32 %s3758_s27, 4  ;;  %s3474_s6 = int_to_ptr.vmem [resolvable:$false] %s3473_s6 }
  0x9d   : > { %s3475_s22 = scalar_lea.vmem %s3474_s6, 32  ;;  %p3476_p13 = scmp.lt.s32.totalorder %s724_s20, %s3474_s6 }
  0x9e   : > { %p3471_p12 = pnand %p3469_p10, %p3992_p5  ;;  %p3477_p2 = scmp.lt.s32.totalorder %s3475_s22, %s3468_s1 }
  0xa0   : > { %p3472_p1 = pneg %p3471_p12  ;;  %p3478_p3 = por %p3477_p2, %p3476_p13 }
  0xa2   : > { %p3479_p6 = pnand %p3478_p3, %p3472_p1 }
  0xa4   : > { %3482 = shalt.err (!%p3479_p6)
}
  0xa5   : > { %3170 = dma.hbm_to_vmem [thread:$0]  (!%p3959_p0), %s721_s28, 16, %s724_s20, %s3986_s4  }
  0xa6   : > { %s3759_s12 = smov [#allocation7]   ;;  %p4558_p11 = scmp.ne.s32.totalorder %s4554_s30, 0 }
  0xa7   : > { %s565_s16 = sshll.u32 %s3759_s12, 4  ;;  %s566_s16 = int_to_ptr.vmem [resolvable:$true] %s565_s16 }
  0xa8   : > { %s3494_s23 = scalar_lea.vmem %s566_s16, 32  ;;  %p3502_p8 = scmp.lt.s32.totalorder %s566_s16, %s566_s16 }
  0xa9   : > { %p3495_p7 = scmp.ne.s32.totalorder %s566_s16, %s3494_s23  ;;  %p3503_p10 = scmp.lt.s32.totalorder %s3494_s23, %s3494_s23 }
  0xab   : > { %p3497_p4 = pnand %p3495_p7, %p4558_p11  ;;  %p3504_p12 = por %p3503_p10, %p3502_p8 }
  0xad   : > { %p3498_p9 = pneg %p3497_p4 }
  0xaf   : > { %p3505_p5 = pnand %p3504_p12, %p3498_p9 }
  0xb1   : > { %3508 = shalt.err (!%p3505_p5)
}
  0xb2   : > { %s3760_s10 = smov 16   ;;  %s3761_s25 = smov 1  }
  0xb3   : > { %p4559_p1 = scmp.ne.s32.totalorder %s4552_s21, 0  ;;  %s4560_s24 = sld [smem:[#allocation34_spill]] }
  0xb4   : > { %s4094_s27 = scalar_lea.hbm %s4504_s13, %s3977_s18  ;;  %s741_s6 = scalar_lea.vmem [#allocation17], %s3955_s3 }
  0xb5   : > { %s748_s22 = sshll.u32 %s741_s6, 4  ;;  %s3762_s12 = smov [#allocation9]   ;;  %s749_s22 = int_to_ptr.vmem [resolvable:$true] %s748_s22 }
  0xb6   : > { %s579_s23 = sshll.u32 %s3762_s12, 4  ;;  %s3509_s5 = scalar_lea.hbm %s4094_s27, 16  ;;  %s580_s23 = int_to_ptr.vmem [resolvable:$true] %s579_s23 }
  0xb7   : > { %p3510_p5 = scmp.ne.s32.totalorder %s4094_s27, %s3509_s5  ;;  %p4561_p13 = scmp.ne.s32.totalorder %s4557_s19, 0 }
  0xb8   : > { %p3515_p6 = scmp.lt.s32.totalorder %s4094_s27, %s4504_s13 }
  0xb9   : > { %3145 = dma.hbm_to_vmem [thread:$0]  (!%p4559_p1), %s4560_s24, 32, %s566_s16, [#allocation8], %s3760_s10, %s3760_s10, %s3761_s25  }
  0xba   : > { %p3512_p2 = pnand %p3510_p5, %p4561_p13  ;;  %s3514_s10 = scalar_lea.hbm %s4504_s13, 32 }
  0xbb   : > { %p3516_p7 = scmp.lt.s32.totalorder %s3514_s10, %s3509_s5 }
  0xbc   : > { %p3513_p3 = pneg %p3512_p2 }
  0xbd   : > { %p3517_p4 = por %p3516_p7, %p3515_p6 }
  0xbf   : > { %p3518_p9 = pnand %p3517_p4, %p3513_p3 }
  0xc1   : > { %3521 = shalt.err (!%p3518_p9)
}
  0xc2   : > { %s3522_s24 = scalar_lea.vmem %s749_s22, 16  ;;  %s3763_s0 = smov [#allocation17]  }
  0xc3   : > { %p3523_p8 = scmp.ne.s32.totalorder %s749_s22, %s3522_s24  ;;  %s3527_s1 = sshll.u32 %s3763_s0, 4  ;;  %s3528_s1 = int_to_ptr.vmem [resolvable:$false] %s3527_s1 }
  0xc4   : > { %s3529_s6 = scalar_lea.vmem %s3528_s1, 32  ;;  %p3530_p5 = scmp.lt.s32.totalorder %s749_s22, %s3528_s1 }
  0xc5   : > { %p3525_p10 = pnand %p3523_p8, %p4561_p13  ;;  %p3531_p2 = scmp.lt.s32.totalorder %s3529_s6, %s3522_s24 }
  0xc7   : > { %p3526_p12 = pneg %p3525_p10  ;;  %p3532_p1 = por %p3531_p2, %p3530_p5 }
  0xc9   : > { %p3533_p11 = pnand %p3532_p1, %p3526_p12 }
  0xcb   : > { %3536 = shalt.err (!%p3533_p11)
}
  0xcc   : > { %3173 = dma.hbm_to_vmem [thread:$0]  (!%p3959_p0), %s4094_s27, 16, %s749_s22, %s3986_s4  }
  0xcd   : > { %s3548_s5 = scalar_lea.vmem %s580_s23, 16  ;;  %p4562_p6 = scmp.ne.s32.totalorder %s4554_s30, 0 }
  0xce   : > { %p3549_p3 = scmp.ne.s32.totalorder %s580_s23, %s3548_s5  ;;  %s3555_s12 = scalar_lea.vmem %s580_s23, 32 }
  0xcf   : > { %p3556_p9 = scmp.lt.s32.totalorder %s580_s23, %s580_s23  ;;  %p3557_p8 = scmp.lt.s32.totalorder %s3555_s12, %s3548_s5 }
  0xd0   : > { %p3551_p7 = pnand %p3549_p3, %p4562_p6 }
  0xd1   : > { %p3558_p10 = por %p3557_p8, %p3556_p9 }
  0xd2   : > { %p3552_p4 = pneg %p3551_p7 }
  0xd4   : > { %p3559_p13 = pnand %p3558_p10, %p3552_p4 }
  0xd6   : > { %3562 = shalt.err (!%p3559_p13)
}
  0xd7   : > { %p4563_p11 = scmp.ne.s32.totalorder %s4552_s21, 0  ;;  %s4564_s10 = sld [smem:[#allocation35_spill]] }
  0xd8   : > { %s763_s25 = scalar_lea.hbm %s4505_s14, %s3977_s18  ;;  %s758_s20 = scalar_lea.vmem [#allocation18], %s3955_s3 }
  0xd9   : > { %s765_s24 = sshll.u32 %s758_s20, 4  ;;  %s3563_s0 = scalar_lea.hbm %s763_s25, 16  ;;  %s766_s24 = int_to_ptr.vmem [resolvable:$true] %s765_s24 }
  0xda   : > { %p3564_p1 = scmp.ne.s32.totalorder %s763_s25, %s3563_s0  ;;  %p4565_p12 = scmp.ne.s32.totalorder %s4557_s19, 0 }
  0xdb   : > { %s3568_s5 = scalar_lea.hbm %s4505_s14, 32  ;;  %p3569_p2 = scmp.lt.s32.totalorder %s763_s25, %s4505_s14 }
  0xdc   : > { %p3566_p13 = pnand %p3564_p1, %p4565_p12  ;;  %p3570_p3 = scmp.lt.s32.totalorder %s3568_s5, %s3563_s0 }
  0xdd   : > { %3148 = dma.hbm_to_vmem [thread:$0]  (!%p4563_p11), %s4564_s10, 16, %s580_s23, [#allocation8]  }
  0xde   : > { %p3567_p5 = pneg %p3566_p13  ;;  %p3571_p7 = por %p3570_p3, %p3569_p2 }
  0xe0   : > { %p3572_p4 = pnand %p3571_p7, %p3567_p5 }
  0xe2   : > { %3575 = shalt.err (!%p3572_p4)
}
  0xe3   : > { %s3576_s23 = scalar_lea.vmem %s766_s24, 16  ;;  %s3764_s16 = smov [#allocation18]  }
  0xe4   : > { %p3577_p9 = scmp.ne.s32.totalorder %s766_s24, %s3576_s23  ;;  %s3581_s10 = sshll.u32 %s3764_s16, 4  ;;  %s3582_s10 = int_to_ptr.vmem [resolvable:$false] %s3581_s10 }
  0xe5   : > { %s3583_s27 = scalar_lea.vmem %s3582_s10, 32  ;;  %p3584_p1 = scmp.lt.s32.totalorder %s766_s24, %s3582_s10 }
  0xe6   : > { %p3579_p8 = pnand %p3577_p9, %p4565_p12  ;;  %p3585_p13 = scmp.lt.s32.totalorder %s3583_s27, %s3576_s23 }
  0xe8   : > { %p3580_p10 = pneg %p3579_p8  ;;  %p3586_p11 = por %p3585_p13, %p3584_p1 }
  0xea   : > { %p3587_p6 = pnand %p3586_p11, %p3580_p10 }
  0xec   : > { %3590 = shalt.err (!%p3587_p6)
}
  0xed   : > { %3176 = dma.hbm_to_vmem [thread:$0]  (!%p3959_p0), %s763_s25, 16, %s766_s24, %s3986_s4  }
  0xee   : > { %s3765_s22 = smov [#allocation10]   ;;  %s3766_s0 = smov [#allocation20]  }
  0xef   : > { %s590_s20 = sshll.u32 %s3765_s22, 4  ;;  %s604_s1 = sshll.u32 %s3766_s0, 4  ;;  %s591_s20 = int_to_ptr.vmem [resolvable:$true] %s590_s20  ;;  %s605_s1 = int_to_ptr.vmem [resolvable:$true] %s604_s1 }
  0xf0   : > { %s3602_s6 = scalar_lea.vmem %s591_s20, 16  ;;  %p4566_p2 = scmp.ne.s32.totalorder %s4554_s30, 0 }
  0xf1   : > { %p3603_p5 = scmp.ne.s32.totalorder %s591_s20, %s3602_s6  ;;  %s3609_s5 = scalar_lea.vmem %s591_s20, 32 }
  0xf2   : > { %p3610_p4 = scmp.lt.s32.totalorder %s591_s20, %s591_s20  ;;  %p3611_p9 = scmp.lt.s32.totalorder %s3609_s5, %s3602_s6 }
  0xf3   : > { %p3605_p3 = pnand %p3603_p5, %p4566_p2 }
  0xf4   : > { %p3612_p11 = por %p3611_p9, %p3610_p4 }
  0xf5   : > { %p3606_p7 = pneg %p3605_p3 }
  0xf7   : > { %p3613_p6 = pnand %p3612_p11, %p3606_p7 }
  0xf9   : > { %3616 = shalt.err (!%p3613_p6)
}
  0xfa   : > { %p4567_p8 = scmp.ne.s32.totalorder %s4552_s21, 0  ;;  %s4568_s24 = sld [smem:[#allocation36_spill]] }
  0xfb   : > { %s3628_s28 = scalar_lea.vmem %s605_s1, 16  ;;  %s3635_s23 = scalar_lea.vmem %s605_s1, 32 }
  0xfc   : > { %p3629_p10 = scmp.ne.s32.totalorder %s605_s1, %s3628_s28  ;;  %p3636_p5 = scmp.lt.s32.totalorder %s605_s1, %s605_s1 }
  0xfd   : > { %p3637_p3 = scmp.lt.s32.totalorder %s3635_s23, %s3628_s28 }
  0xfe   : > { %p3631_p1 = pnand %p3629_p10, %p4566_p2 }
  0xff   : > { %p3638_p0 = por %p3637_p3, %p3636_p5 }
 0x100   : > { %3151 = dma.hbm_to_vmem [thread:$0]  (!%p4567_p8), %s4568_s24, 16, %s591_s20, [#allocation11]  }
 0x101   : > { %p3632_p13 = pneg %p3631_p1 }
 0x103   : > { %p3639_p4 = pnand %p3638_p0, %p3632_p13 }
 0x105   : > { %3642 = shalt.err (!%p3639_p4)
}
 0x106   : > { %3154 = dma.hbm_to_vmem [thread:$0]  (!%p4567_p8), %s4508_s17, 16, %s605_s1, [#allocation8]  }
 0x107   : > { %s780_s30 = scalar_lea.hbm %s4506_s15, %s3977_s18  ;;  %s775_s20 = scalar_lea.vmem [#allocation19], %s3955_s3 }
 0x108   : > { %s782_s0 = sshll.u32 %s775_s20, 4  ;;  %s3643_s6 = scalar_lea.hbm %s780_s30, 16  ;;  %s783_s0 = int_to_ptr.vmem [resolvable:$true] %s782_s0 }
 0x109   : > { %p3644_p2 = scmp.ne.s32.totalorder %s780_s30, %s3643_s6  ;;  %s3648_s12 = scalar_lea.hbm %s4506_s15, 32 }
 0x10a   : > { %p3649_p9 = scmp.lt.s32.totalorder %s780_s30, %s4506_s15  ;;  %p3650_p11 = scmp.lt.s32.totalorder %s3648_s12, %s3643_s6 }
 0x10b   : > { %p3646_p0 = pnand %p3644_p2, %p4565_p12 }
 0x10c   : > { %p3651_p6 = por %p3650_p11, %p3649_p9 }
 0x10d   : > { %p3647_p7 = pneg %p3646_p0 }
 0x10f   : > { %p3652_p8 = pnand %p3651_p6, %p3647_p7 }
 0x111   : > { %3655 = shalt.err (!%p3652_p8)
}
 0x112   : > { %s3656_s18 = scalar_lea.vmem %s783_s0, 16  ;;  %s3767_s3 = smov [#allocation19]  }
 0x113   : > { %p3657_p10 = scmp.ne.s32.totalorder %s783_s0, %s3656_s18  ;;  %s3661_s1 = sshll.u32 %s3767_s3, 4  ;;  %s3662_s1 = int_to_ptr.vmem [resolvable:$false] %s3661_s1 }
 0x114   : > { %s3663_s28 = scalar_lea.vmem %s3662_s1, 32  ;;  %p3664_p5 = scmp.lt.s32.totalorder %s783_s0, %s3662_s1 }
 0x115   : > { %p3659_p1 = pnand %p3657_p10, %p4565_p12  ;;  %p3665_p3 = scmp.lt.s32.totalorder %s3663_s28, %s3656_s18 }
 0x117   : > { %p3660_p13 = pneg %p3659_p1  ;;  %p3666_p4 = por %p3665_p3, %p3664_p5 }
 0x119   : > { %p3667_p2 = pnand %p3666_p4, %p3660_p13 }
 0x11b   : > { %3670 = shalt.err (!%p3667_p2)
}
 0x11c   : > { %p4569_p0 = scmp.ne.s32.totalorder %s4553_s26, 0  ;;  %p4570_p7 = scmp.ne.s32.totalorder %s4551_s29, 0 }
 0x11d   : > { %p4571_p9 = scmp.eq.s32.totalorder (!%p4570_p7), %s3911_s2, 0 }
 0x11e   : > { %3179 = dma.hbm_to_vmem [thread:$0]  (!%p4569_p0), %s780_s30, 16, %s783_s0, %s3986_s4  }
 0x11f   : > { %791 = sbr.rel (%p4570_p7) target bundleno = 5050 (0x13ba), region = 100 }
 0x124   : > { %3712 = dma.done.wait (%p4571_p9), [#allocation5], 256   ;;  %p4572_p12 = pmov %p4571_p9 }
 0x125   : > { %p4573_p11 = pmov %p4571_p9 }
 0x126   : > { %3714 = vsyncadd (%p4572_p12), [#allocation5], 4294967040 }
 0x127   : > { %3716 = dma.done.wait (%p4573_p11), [#allocation8], 48   ;;  %p4574_p6 = pmov %p4571_p9 }
 0x129   : > { %3718 = vsyncadd (%p4574_p6), [#allocation8], 4294967248  ;;  %p4575_p8 = pmov %p4574_p6 }
 0x12a   : > { %p4576_p10 = pmov %p4574_p6 }
 0x12b   : > { %3720 = dma.done.wait (%p4575_p8), [#allocation11], 16  }
 0x12c   : > { %3722 = vsyncadd (%p4576_p10), [#allocation11], 4294967280  ;;  %s4577_s4 = sld [smem:[#allocation28_spill]]  ;;  %s809_s26 = sand.u32 1, %s3911_s2  }
 0x12d   : > { %s4578_s29 = sld [smem:[#allocation32_spill]]  ;;  %s810_s23 = scalar_lea.sflag [#allocation5], %s809_s26 }
 0x132   : > { %s4187_s19 = sand.u32 1, %s4577_s4  }
 0x133   : > { %s812_s16 = scalar_lea.vmem [#allocation12], %s4187_s19  ;;  %p4579_p1 = scmp.ne.s32.totalorder %s4578_s29, 0 }
 0x135   : > { %3724 = dma.done.wait (%p4579_p1), %s810_s23, 128  }
 0x136   : > { %3726 = vsyncadd (%p4579_p1), %s810_s23, 4294967168  ;;  %s820_s10 = scalar_lea.vmem [#allocation13], %s4187_s19  ;;  %p4580_p13 = pmov %p4574_p6 }
 0x137   : > { %p4581_p5 = pmov %p4574_p6 }
 0x138   : > { %3728 = dma.done.wait (%p4580_p13), [#allocation8], 16  }
 0x139   : > { %3730 = vsyncadd (%p4581_p5), [#allocation8], 4294967280  ;;  %p971_p3 = scmp.lt.s32.totalorder %s3911_s2, 1  ;;  %s4582_s18 = sld [smem:[#allocation37_spill]] }
 0x13a   : > { %s4583_s4 = sld [smem:[#allocation39_spill]]  ;;  %p4586_p4 = scmp.ne.s32.totalorder %s3911_s2, 0 }
 0x13b   : > { %s972_s21 = scalar_select %p971_p3, %s3911_s2, 1 }
 0x13c   : > { %s4584_s6 = sld [smem:[#allocation40_spill]] }
 0x13d   : > { %s2895_s5 = sshll.u32 %s972_s21, 4  ;;  %s2898_s12 = sshll.u32 %s972_s21, 5 }
 0x13e   : > { %s4585_s22 = sld [smem:[#allocation41_spill]] }
 0x13f   : > { %s4210_s3 = scalar_lea.vmem %s4582_s18, %s2895_s5 }
 0x140   : > { %s4215_s29 = scalar_lea.vmem %s4583_s4, %s2895_s5  ;;  %995 = sbr.rel (%p4586_p4) target bundleno = 639 (0x27f), region = 156 }
 0x142   : > { %s4220_s0 = scalar_lea.vmem %s4584_s6, %s2895_s5 }
 0x144   : > { %s4225_s27 = scalar_lea.vmem %s4585_s22, %s2898_s12 }
 0x145   : > { %v996_v0 = vld [vmem:[#allocation4] sm:$0xff]  ;;  %vm1000_vm0 = vcmask 261120   ;;  %v997_v1 = vld [vmem:[#allocation4 + $0x8] sm:$0xff]  ;;  %v2840_v21 = vld [vmem:[#allocation9] ss:$0 sm:$0xff] }
 0x146   : > { %v1001_v2 = vsel %vm1000_vm0, %v996_v0, 0.0  ;;  %v1004_v3 = vsel %vm1000_vm0, %v997_v1, 0.0  ;;  %v2841_v23 = vld [vmem:[#allocation10] ss:$0 sm:$0xff] }
 0x147   : > { %1002 = vadd.xlane.f32.xlu0 %v1001_v2 }
 0x14b   : > { %1005 = vadd.xlane.f32.xlu0 %v1004_v3 }
 0x1d0   : > { %v1003_v4 = vpop.xlane.xlu0 %1002 }
 0x1d1   : > { %v1008_v5 = vmul.f32 0.03125, %v1003_v4 }
 0x1d3   : > { %v1010_v6 = vsub.f32 %v996_v0, %v1008_v5 }
 0x1d4   : > { %v1006_v7 = vpop.xlane.xlu0 %1005 }
 0x1d5   : > { %v1009_v8 = vmul.f32 0.03125, %v1006_v7  ;;  %v1012_v9 = vmul.f32 %v1010_v6, %v1010_v6 }
 0x1d7   : > { %v1011_v10 = vsub.f32 %v997_v1, %v1009_v8  ;;  %v1014_v11 = vsel %vm1000_vm0, %v1012_v9, 0.0 }
 0x1d8   : > { %1015 = vadd.xlane.f32.xlu1 %v1014_v11 }
 0x1d9   : > { %v1013_v12 = vmul.f32 %v1011_v10, %v1011_v10 }
 0x1db   : > { %v1017_v13 = vsel %vm1000_vm0, %v1013_v12, 0.0 }
 0x1dc   : > { %1018 = vadd.xlane.f32.xlu1 %v1017_v13 }
 0x261   : > { %v1016_v14 = vpop.xlane.xlu1 %1015 }
 0x262   : > { %v1020_v15 = vmul.f32 0.03125, %v1016_v14 }
 0x264   : > { %v1022_v16 = vadd.f32 1e-12, %v1020_v15 }
 0x265   : > { %v1019_v17 = vpop.xlane.xlu1 %1018 }
 0x266   : > { %3253 = vrsqrt.f32 %v1022_v16  ;;  %v1021_v18 = vmul.f32 0.03125, %v1019_v17 }
 0x268   : > { %v1023_v19 = vadd.f32 1e-12, %v1021_v18 }
 0x26a   : > { %3255 = vrsqrt.f32 %v1023_v19 }
 0x273   : > { %v3254_v20 = vpop.eup %3253 }
 0x274   : > { %v1026_v22 = vmul.f32 %v3254_v20, %v1010_v6 }
 0x276   : > { %v1034_v24 = vmul.f32 %v2840_v21, %v1026_v22 }
 0x277   : > { %v3256_v25 = vpop.eup %3255 }
 0x278   : > { %v1042_v26 = vadd.f32 %v2841_v23, %v1034_v24  ;;  %v1027_v27 = vmul.f32 %v3256_v25, %v1011_v10 }
 0x27a   : > { %1044 = vst.msk [vmem:[#allocation2] sm:$0xff] %vm1000_vm0, %v1042_v26  ;;  %v1035_v28 = vmul.f32 %v2840_v21, %v1027_v27 }
 0x27c   : > { %v1043_v29 = vadd.f32 %v2841_v23, %v1035_v28 }
 0x27e   : > { %1045 = vst.msk [vmem:[#allocation2 + $0x8] sm:$0xff] %vm1000_vm0, %v1043_v29 }
 0x27f PF: > { %v3257_v30 = vld [vmem:[%s4210_s3 + $0x8] sm:$0xff]   ;;  %v3768_v31 = vmov 0.0   ;;  %v3258_v32 = vld [vmem:[%s4210_s3] sm:$0xff]   ;;  %vm3769_vm1 = vmmov 0   ;;  %vm1072_vm2 = vcmask 261120   ;;  %s3770_s22 = smov 96  }
 0x280   : > { %2951 = vmatprep.subr.bf16.mxu0 %v3768_v31  ;;  %2959 = vmatprep.subr.bf16.mxu1 %v3768_v31  ;;  %v2842_v36 = vld [vmem:[%s812_s16] ss:$0 sm:$0xff]  ;;  %vm1124_vm3 = vcmask 64512   ;;  %v4274_v50 = vld [vmem:[#allocation7] ss:$0 sm:$0xff]  ;;  %s3771_s16 = smov 64  }
 0x281   : > { %2952 = vmatpush3.bf16.msra.mxu0 %v3257_v30  ;;  %2955 = vmatprep.mubr.msk.bf16.mxu0 %vm3769_vm1, %v3768_v31  ;;  %v4241_v33 = vld [vmem:[#allocation2] sm:$0xff]  ;;  %v4277_v56 = vld [vmem:[#allocation7 + $0x1] ss:$0 sm:$0xff]  ;;  %s3772_s30 = smov 88   ;;  %vm1265_vm4 = vcmask 1043456   ;;  %s3773_s20 = smov 120  }
 0x282   : > { %2953 = vmatprep.subr.bf16.mxu0 %v3768_v31  ;;  %2961 = vmatprep.mubr.msk.bf16.mxu1 %vm3769_vm1, %v3768_v31  ;;  %s3774_s6 = smov 56   ;;  %s3775_s21 = smov 80   ;;  %vm1591_vm5 = vcmask 130112   ;;  %vm1826_vm6 = vcmask 195712   ;;  %vm2061_vm7 = vcmask 261312   ;;  %vm2307_vm8 = vcmask 523264  }
 0x283   : > { %s3776_s5 = smov 112   ;;  %s3777_s12 = smov 48  }
 0x284   : > { %s3778_s25 = smov 72   ;;  %s3779_s24 = smov 104  }
 0x285   : > { %v4243_v34 = vld [vmem:[#allocation2 + $0x8] sm:$0xff]  ;;  %2954 = vmatpush3.bf16.msra.mxu0 %v3258_v32  ;;  %s3780_s18 = smov 40   ;;  %s3781_s3 = smov 8  }
 0x286   : > { %v1048_v35 = vpack.c.bf16 %v4243_v34, %v4241_v33  ;;  %2965 = vmatprep.subr.bf16.mxu0 %v3768_v31  ;;  %s3782_s1 = smov 16   ;;  %s3783_s28 = smov 24  }
 0x287   : > { %s4589_s4 = scalar_lea.vmem [#allocation16], %s4187_s19  ;;  %s4592_s26 = scalar_lea.vmem [#allocation19], %s4187_s19 }
 0x288   : > { %2956 = vmatmul.mubr.msk.bf16.vlgmr.msra.gmra.mxu0 %vm1072_vm2, %v1048_v35  ;;  %p2882_p2 = scmp.ne.s32.totalorder %s3911_s2, 1 }
 0x289   : > { %2967 = vmatprep.mubr.msk.bf16.mxu0 %vm3769_vm1, %v3768_v31 }
 0x348   : > { %v1110_v37 = vpop.f32.mrf.mxu0 }
 0x349   : > { %v1111_v38 = vadd.f32 %v2842_v36, %v1110_v37 }
 0x34a   : > { %v2957_v39 = vpop.f32.mrf.mxu0 }
 0x34b   : > { %v4256_v40 = vpack.c.bf16 %v1111_v38, %v1111_v38 }
 0x34c   : > { %v1113_v41 = vpop.f32.mrf.mxu0 }
 0x34d   : > { %v1114_v42 = vadd.f32 %v2842_v36, %v1113_v41  ;;  %1122 = vrot.lane.b32.xlu0 %v4256_v40, %s3770_s22 }
 0x34e   : > { %v2958_v43 = vpop.f32.mrf.mxu0 }
 0x34f   : > { %v4259_v44 = vpack.c.bf16 %v1114_v42, %v1114_v42 }
 0x351   : > { %1172 = vrot.lane.b32.xlu0 %v4259_v44, %s3770_s22 }
 0x3bf   : > { %v1123_v45 = vpop.permute.xlu0 %1122 }
 0x3c0   : > { %v1129_v46 = vsel %vm1124_vm3, %v1123_v45, 0 }
 0x3c1   : > { %2960 = vmatpush3.bf16.xpose.msra.mxu1 %v1129_v46 }
 0x3c2   : > { %2971 = vmatprep.subr.bf16.mxu1 %v3768_v31 }
 0x3c3   : > { %v1173_v47 = vpop.permute.xlu0 %1172 }
 0x3c4   : > { %v1178_v48 = vsel %vm1124_vm3, %v1173_v47, 0 }
 0x3c5   : > { %2966 = vmatpush3.bf16.xpose.msra.mxu0 %v1178_v48 }
 0x3c6   : > { %2977 = vmatprep.subr.bf16.mxu0 %v3768_v31 }
 0x3c8   : > { %2962 = vmatmul.mubr.msk.bf16.vlgmr.msra.gmra.mxu1 %vm1124_vm3, %v4256_v40 }
 0x3c9   : > { %2973 = vmatprep.mubr.msk.bf16.mxu1 %vm3769_vm1, %v3768_v31 }
 0x3cc   : > { %2968 = vmatmul.mubr.msk.bf16.vlgmr.msra.gmra.mxu0 %vm1124_vm3, %v4259_v44 }
 0x3cd   : > { %2979 = vmatprep.mubr.msk.bf16.mxu0 %vm3769_vm1, %v3768_v31 }
 0x488   : > { %v1165_v49 = vpop.f32.mrf.mxu1 }
 0x489   : > { %v1220_v51 = vmul.f32 0.35355338, %v1165_v49 }
 0x48a   : > { %v2963_v52 = vpop.f32.mrf.mxu1 }
 0x48b   : > { %v1234_v53 = vadd.f32 %v4274_v50, %v1220_v51 }
 0x48c   : > { %v1168_v54 = vpop.f32.mrf.mxu1  ;;  %v1214_v55 = vpop.f32.mrf.mxu0 }
 0x48d   : > { %v1221_v57 = vmul.f32 0.35355338, %v1214_v55  ;;  %v1236_v58 = vsel %vm1124_vm3, %v1234_v53, -inf }
 0x48e   : > { %1237 = vmax.xlane.f32.xlu1 %v1236_v58  ;;  %v2964_v59 = vpop.f32.mrf.mxu1  ;;  %v2969_v60 = vpop.f32.mrf.mxu0 }
 0x48f   : > { %v1235_v61 = vadd.f32 %v4277_v56, %v1221_v57 }
 0x490   : > { %v1217_v62 = vpop.f32.mrf.mxu0 }
 0x491   : > { %v1239_v63 = vsel %vm1124_vm3, %v1235_v61, -inf }
 0x492   : > { %1240 = vmax.xlane.f32.xlu1 %v1239_v63  ;;  %v2970_v0 = vpop.f32.mrf.mxu0 }
 0x4a3   : > { %1260 = vrot.lane.b32.xlu1 %v4256_v40, %s3771_s16 }
 0x4a7   : > { %1309 = vrot.lane.b32.xlu1 %v4259_v44, %s3771_s16  ;;  %s4593_s16 = sld [smem:[#allocation42_spill]] (!%p2882_p2) }
 0x4ab   : > { %1361 = vrot.lane.b32.xlu1 %v4256_v40, %s3772_s30 }
 0x517   : > { %v1238_v1 = vpop.xlane.xlu1 %1237 }
 0x518   : > { %v1242_v2 = vsub.f32 %v1234_v53, %v1238_v1 }
 0x51a   : > { %v1244_v3 = vmul.f32 1.442695, %v1242_v2 }
 0x51b   : > { %v1241_v4 = vpop.xlane.xlu1 %1240 }
 0x51c   : > { %3267 = vpow2.f32 %v1244_v3  ;;  %v1243_v5 = vsub.f32 %v1235_v61, %v1241_v4 }
 0x51e   : > { %v1246_v6 = vmul.f32 1.442695, %v1243_v5 }
 0x51f   : > { %v1261_v7 = vpop.permute.xlu1 %1260 }
 0x520   : > { %3269 = vpow2.f32 %v1246_v6  ;;  %v1267_v8 = vsel %vm1265_vm4, %v1261_v7, 0 }
 0x521   : > { %2972 = vmatpush3.bf16.msra.mxu1 %v1267_v8 }
 0x522   : > { %2983 = vmatprep.subr.bf16.mxu1 %v3768_v31 }
 0x523   : > { %v1310_v9 = vpop.permute.xlu1 %1309 }
 0x524   : > { %v1315_v10 = vsel %vm1265_vm4, %v1310_v9, 0 }
 0x525   : > { %2978 = vmatpush3.bf16.msra.mxu0 %v1315_v10 }
 0x526   : > { %2989 = vmatprep.subr.bf16.mxu0 %v3768_v31 }
 0x527   : > { %v1362_v15 = vpop.permute.xlu1 %1361 }
 0x528   : > { %v1367_v22 = vsel %vm1124_vm3, %v1362_v15, 0 }
 0x529   : > { %v3268_v11 = vpop.eup %3267 }
 0x52a   : > { %v1248_v12 = vsel %vm1124_vm3, %v3268_v11, 0.0 }
 0x52b   : > { %1249 = vadd.xlane.f32.xlu0 %v1248_v12 }
 0x52d   : > { %v3270_v13 = vpop.eup %3269 }
 0x52e   : > { %v1251_v14 = vsel %vm1124_vm3, %v3270_v13, 0.0 }
 0x52f   : > { %1252 = vadd.xlane.f32.xlu1 %v1251_v14 }
 0x540   : > { %1411 = vrot.lane.b32.xlu1 %v4259_v44, %s3772_s30 }
 0x541   : > { %1359 = vrot.lane.b32.xlu0 %v4256_v40, %s3773_s20 }
 0x544   : > { %1409 = vrot.lane.b32.xlu1 %v4259_v44, %s3773_s20 }
 0x5b4   : > { %v1250_v16 = vpop.xlane.xlu0 %1249 }
 0x5b5   : > { %3271 = vrcp.f32 %v1250_v16 }
 0x5b8   : > { %v1253_v17 = vpop.xlane.xlu1 %1252  ;;  %v1360_v27 = vpop.permute.xlu0 %1359 }
 0x5b9   : > { %3273 = vrcp.f32 %v1253_v17 }
 0x5bc   : > { %v1412_v24 = vpop.permute.xlu1 %1411 }
 0x5bd   : > { %v1417_v26 = vsel %vm1124_vm3, %v1412_v24, 0 }
 0x5c0   : > { %v1410_v28 = vpop.permute.xlu1 %1409 }
 0x5c2   : > { %v3272_v18 = vpop.eup %3271 }
 0x5c3   : > { %v1255_v19 = vmul.f32 %v3272_v18, %v3268_v11 }
 0x5c5   : > { %v1258_v20 = vpack.c.bf16 %v1255_v19, %v1255_v19 }
 0x5c6   : > { %v3274_v21 = vpop.eup %3273 }
 0x5c7   : > { %2974 = vmatmul.mubr.msk.bf16.vlgmr.msra.gmra.mxu1 %vm1124_vm3, %v1258_v20  ;;  %v1257_v23 = vmul.f32 %v3274_v21, %v3270_v13 }
 0x5c8   : > { %2984 = vmatpush3.bf16.xpose.msra.mxu1 %v1367_v22  ;;  %2985 = vmatprep.mubr.msk.bf16.mxu1 %vm3769_vm1, %v3768_v31 }
 0x5c9   : > { %v1259_v25 = vpack.c.bf16 %v1257_v23, %v1257_v23  ;;  %2995 = vmatprep.subr.bf16.mxu1 %v3768_v31 }
 0x5cb   : > { %2980 = vmatmul.mubr.msk.bf16.vlgmr.msra.gmra.mxu0 %vm1124_vm3, %v1259_v25 }
 0x5cc   : > { %2990 = vmatpush3.bf16.xpose.msra.mxu0 %v1417_v26  ;;  %2991 = vmatprep.mubr.msk.bf16.mxu0 %vm3769_vm1, %v3768_v31 }
 0x5cd   : > { %3001 = vmatprep.subr.bf16.mxu0 %v3768_v31 }
 0x5cf   : > { %2986 = vmatmul.mubr.msk.bf16.vlgmr.msra.gmra.mxu1 %vm1124_vm3, %v1360_v27 }
 0x5d0   : > { %2997 = vmatprep.mubr.msk.bf16.mxu1 %vm3769_vm1, %v3768_v31 }
 0x5d3   : > { %2992 = vmatmul.mubr.msk.bf16.vlgmr.msra.gmra.mxu0 %vm1124_vm3, %v1410_v28 }
 0x5d4   : > { %3003 = vmatprep.mubr.msk.bf16.mxu0 %vm3769_vm1, %v3768_v31 }
 0x687   : > { %v1303_v29 = vpop.f32.mrf.mxu1 }
 0x688   : > { %1357 = vst.msk [vmem:[#allocation3] sm:$0xff] %vm1124_vm3, %v1303_v29 }
 0x689   : > { %v2975_v30 = vpop.f32.mrf.mxu1 }
 0x68b   : > { %v1306_v32 = vpop.f32.mrf.mxu1  ;;  %v1351_v35 = vpop.f32.mrf.mxu0 }
 0x68c   : > { %1358 = vst.msk [vmem:[#allocation3 + $0x8] sm:$0xff] %vm1124_vm3, %v1351_v35 }
 0x68d   : > { %v2976_v36 = vpop.f32.mrf.mxu1  ;;  %v2981_v37 = vpop.f32.mrf.mxu0 }
 0x68f   : > { %v1354_v38 = vpop.f32.mrf.mxu0  ;;  %v1403_v39 = vpop.f32.mrf.mxu1 }
 0x690   : > { %v1459_v41 = vmul.f32 0.35355338, %v1403_v39 }
 0x691   : > { %v2982_v42 = vpop.f32.mrf.mxu0  ;;  %v2987_v43 = vpop.f32.mrf.mxu1 }
 0x692   : > { %v1461_v45 = vadd.f32 %v4274_v50, %v1459_v41 }
 0x693   : > { %v1406_v46 = vpop.f32.mrf.mxu1  ;;  %v1453_v47 = vpop.f32.mrf.mxu0 }
 0x694   : > { %v1460_v48 = vmul.f32 0.35355338, %v1453_v47  ;;  %v1463_v49 = vsel %vm1124_vm3, %v1461_v45, -inf }
 0x695   : > { %1464 = vmax.xlane.f32.xlu1 %v1463_v49  ;;  %v2988_v51 = vpop.f32.mrf.mxu1  ;;  %v2993_v52 = vpop.f32.mrf.mxu0 }
 0x696   : > { %v1462_v53 = vadd.f32 %v4277_v56, %v1460_v48 }
 0x697   : > { %v1456_v54 = vpop.f32.mrf.mxu0 }
 0x698   : > { %v1466_v55 = vsel %vm1124_vm3, %v1462_v53, -inf }
 0x699   : > { %1467 = vmax.xlane.f32.xlu0 %v1466_v55  ;;  %v2994_v57 = vpop.f32.mrf.mxu0 }
 0x6a6   : > { %1487 = vrot.lane.b32.xlu1 %v4256_v40, %s3774_s6 }
 0x6aa   : > { %1596 = vrot.lane.b32.xlu1 %v4256_v40, %s3775_s21 }
 0x6af   : > { %1535 = vrot.lane.b32.xlu0 %v4259_v44, %s3774_s6 }
 0x6b3   : > { %1594 = vrot.lane.b32.xlu0 %v4256_v40, %s3776_s5 }
 0x71e   : > { %v1465_v58 = vpop.xlane.xlu1 %1464 }
 0x71f   : > { %v1469_v59 = vsub.f32 %v1461_v45, %v1465_v58 }
 0x721   : > { %v1471_v60 = vmul.f32 1.442695, %v1469_v59 }
 0x722   : > { %v1488_v61 = vpop.permute.xlu1 %1487  ;;  %v1468_v62 = vpop.xlane.xlu0 %1467 }
 0x723   : > { %3275 = vpow2.f32 %v1471_v60  ;;  %v1493_v63 = vsel %vm1265_vm4, %v1488_v61, 0  ;;  %v1470_v0 = vsub.f32 %v1462_v53, %v1468_v62 }
 0x724   : > { %2996 = vmatpush3.bf16.msra.mxu1 %v1493_v63 }
 0x725   : > { %v1473_v1 = vmul.f32 1.442695, %v1470_v0  ;;  %3007 = vmatprep.subr.bf16.mxu1 %v3768_v31 }
 0x726   : > { %v1536_v2 = vpop.permute.xlu0 %1535  ;;  %v1597_v8 = vpop.permute.xlu1 %1596 }
 0x727   : > { %3277 = vpow2.f32 %v1473_v1  ;;  %v1541_v3 = vsel %vm1265_vm4, %v1536_v2, 0  ;;  %v1602_v15 = vsel %vm1124_vm3, %v1597_v8, 0 }
 0x728   : > { %3002 = vmatpush3.bf16.msra.mxu0 %v1541_v3 }
 0x729   : > { %3013 = vmatprep.subr.bf16.mxu0 %v3768_v31 }
 0x72a   : > { %v1595_v20 = vpop.permute.xlu0 %1594 }
 0x730   : > { %v3276_v4 = vpop.eup %3275 }
 0x731   : > { %v1475_v5 = vsel %vm1124_vm3, %v3276_v4, 0.0 }
 0x732   : > { %1476 = vadd.xlane.f32.xlu1 %v1475_v5 }
 0x734   : > { %v3278_v6 = vpop.eup %3277 }
 0x735   : > { %v1478_v7 = vsel %vm1124_vm3, %v3278_v6, 0.0 }
 0x736   : > { %1479 = vadd.xlane.f32.xlu1 %v1478_v7 }
 0x747   : > { %1646 = vrot.lane.b32.xlu1 %v4259_v44, %s3775_s21  ;;  %s4594_s21 = sld [smem:[#allocation43_spill]] (!%p2882_p2) }
 0x74b   : > { %1644 = vrot.lane.b32.xlu1 %v4259_v44, %s3776_s5 }
 0x7bb   : > { %v1477_v9 = vpop.xlane.xlu1 %1476 }
 0x7bc   : > { %3279 = vrcp.f32 %v1477_v9 }
 0x7bf   : > { %v1480_v10 = vpop.xlane.xlu1 %1479 }
 0x7c0   : > { %3281 = vrcp.f32 %v1480_v10 }
 0x7c3   : > { %v1647_v17 = vpop.permute.xlu1 %1646 }
 0x7c4   : > { %v1652_v19 = vsel %vm1124_vm3, %v1647_v17, 0 }
 0x7c7   : > { %v1645_v21 = vpop.permute.xlu1 %1644 }
 0x7c9   : > { %v3280_v11 = vpop.eup %3279 }
 0x7ca   : > { %v1482_v12 = vmul.f32 %v3280_v11, %v3276_v4 }
 0x7cc   : > { %v1485_v13 = vpack.c.bf16 %v1482_v12, %v1482_v12 }
 0x7cd   : > { %v3282_v14 = vpop.eup %3281 }
 0x7ce   : > { %2998 = vmatmul.mubr.msk.bf16.vlgmr.msra.gmra.mxu1 %vm1124_vm3, %v1485_v13  ;;  %v1484_v16 = vmul.f32 %v3282_v14, %v3278_v6 }
 0x7cf   : > { %3008 = vmatpush3.bf16.xpose.msra.mxu1 %v1602_v15  ;;  %3009 = vmatprep.mubr.msk.bf16.mxu1 %vm3769_vm1, %v3768_v31 }
 0x7d0   : > { %v1486_v18 = vpack.c.bf16 %v1484_v16, %v1484_v16  ;;  %3019 = vmatprep.subr.bf16.mxu1 %v3768_v31 }
 0x7d2   : > { %3004 = vmatmul.mubr.msk.bf16.vlgmr.msra.gmra.mxu0 %vm1124_vm3, %v1486_v18 }
 0x7d3   : > { %3014 = vmatpush3.bf16.xpose.msra.mxu0 %v1652_v19  ;;  %3015 = vmatprep.mubr.msk.bf16.mxu0 %vm3769_vm1, %v3768_v31 }
 0x7d4   : > { %3025 = vmatprep.subr.bf16.mxu0 %v3768_v31 }
 0x7d6   : > { %3010 = vmatmul.mubr.msk.bf16.vlgmr.msra.gmra.mxu1 %vm1124_vm3, %v1595_v20 }
 0x7d7   : > { %3021 = vmatprep.mubr.msk.bf16.mxu1 %vm3769_vm1, %v3768_v31 }
 0x7da   : > { %3016 = vmatmul.mubr.msk.bf16.vlgmr.msra.gmra.mxu0 %vm1124_vm3, %v1645_v21 }
 0x7db   : > { %3027 = vmatprep.mubr.msk.bf16.mxu0 %vm3769_vm1, %v3768_v31 }
 0x88e   : > { %v4344_v22 = vpop.f32.mrf.mxu1 }
 0x890   : > { %v2999_v23 = vpop.f32.mrf.mxu1 }
 0x892   : > { %v1532_v24 = vpop.f32.mrf.mxu1  ;;  %v4346_v25 = vpop.f32.mrf.mxu0 }
 0x894   : > { %v3000_v26 = vpop.f32.mrf.mxu1  ;;  %v3005_v27 = vpop.f32.mrf.mxu0 }
 0x896   : > { %v1580_v28 = vpop.f32.mrf.mxu0  ;;  %v1638_v29 = vpop.f32.mrf.mxu1 }
 0x897   : > { %v1694_v30 = vmul.f32 0.35355338, %v1638_v29 }
 0x898   : > { %v3006_v32 = vpop.f32.mrf.mxu0  ;;  %v3011_v35 = vpop.f32.mrf.mxu1 }
 0x899   : > { %v1696_v36 = vadd.f32 %v4274_v50, %v1694_v30 }
 0x89a   : > { %v1641_v37 = vpop.f32.mrf.mxu1  ;;  %v1688_v38 = vpop.f32.mrf.mxu0 }
 0x89b   : > { %v1695_v39 = vmul.f32 0.35355338, %v1688_v38  ;;  %v1698_v41 = vsel %vm1124_vm3, %v1696_v36, -inf }
 0x89c   : > { %1699 = vmax.xlane.f32.xlu0 %v1698_v41  ;;  %v3012_v42 = vpop.f32.mrf.mxu1  ;;  %v3017_v43 = vpop.f32.mrf.mxu0 }
 0x89d   : > { %v1697_v45 = vadd.f32 %v4277_v56, %v1695_v39 }
 0x89e   : > { %v1691_v46 = vpop.f32.mrf.mxu0 }
 0x89f   : > { %v1701_v47 = vsel %vm1124_vm3, %v1697_v45, -inf }
 0x8a0   : > { %1702 = vmax.xlane.f32.xlu1 %v1701_v47  ;;  %v3018_v48 = vpop.f32.mrf.mxu0 }
 0x8b1   : > { %1722 = vrot.lane.b32.xlu1 %v4256_v40, %s3777_s12 }
 0x8b5   : > { %1831 = vrot.lane.b32.xlu1 %v4256_v40, %s3778_s25 }
 0x8b9   : > { %1881 = vrot.lane.b32.xlu1 %v4259_v44, %s3778_s25 }
 0x8bd   : > { %1879 = vrot.lane.b32.xlu1 %v4259_v44, %s3779_s24 }
 0x925   : > { %v1700_v49 = vpop.xlane.xlu0 %1699 }
 0x926   : > { %v1704_v51 = vsub.f32 %v1696_v36, %v1700_v49 }
 0x928   : > { %v1706_v52 = vmul.f32 1.442695, %v1704_v51 }
 0x929   : > { %v1703_v53 = vpop.xlane.xlu1 %1702 }
 0x92a   : > { %3283 = vpow2.f32 %v1706_v52  ;;  %v1705_v54 = vsub.f32 %v1697_v45, %v1703_v53 }
 0x92c   : > { %v1708_v55 = vmul.f32 1.442695, %v1705_v54 }
 0x92d   : > { %v1723_v57 = vpop.permute.xlu1 %1722 }
 0x92e   : > { %3285 = vpow2.f32 %v1708_v55  ;;  %v1728_v58 = vsel %vm1265_vm4, %v1723_v57, 0 }
 0x92f   : > { %3020 = vmatpush3.bf16.msra.mxu1 %v1728_v58 }
 0x930   : > { %3031 = vmatprep.subr.bf16.mxu1 %v3768_v31 }
 0x931   : > { %v1832_v4 = vpop.permute.xlu1 %1831 }
 0x932   : > { %v1837_v8 = vsel %vm1124_vm3, %v1832_v4, 0 }
 0x935   : > { %v1882_v10 = vpop.permute.xlu1 %1881 }
 0x936   : > { %v1887_v12 = vsel %vm1124_vm3, %v1882_v10, 0 }
 0x937   : > { %v3284_v59 = vpop.eup %3283 }
 0x938   : > { %v1710_v60 = vsel %vm1124_vm3, %v3284_v59, 0.0 }
 0x939   : > { %1711 = vadd.xlane.f32.xlu0 %v1710_v60  ;;  %v1880_v14 = vpop.permute.xlu1 %1879 }
 0x93b   : > { %v3286_v61 = vpop.eup %3285 }
 0x93c   : > { %v1713_v62 = vsel %vm1124_vm3, %v3286_v61, 0.0 }
 0x93d   : > { %1714 = vadd.xlane.f32.xlu0 %v1713_v62 }
 0x953   : > { %1770 = vrot.lane.b32.xlu0 %v4259_v44, %s3777_s12 }
 0x957   : > { %1829 = vrot.lane.b32.xlu0 %v4256_v40, %s3779_s24 }
 0x9c2   : > { %v1712_v63 = vpop.xlane.xlu0 %1711 }
 0x9c3   : > { %3287 = vrcp.f32 %v1712_v63 }
 0x9c6   : > { %v1715_v0 = vpop.xlane.xlu0 %1714 }
 0x9c7   : > { %3289 = vrcp.f32 %v1715_v0 }
 0x9ca   : > { %v1771_v1 = vpop.permute.xlu0 %1770 }
 0x9cb   : > { %v1776_v2 = vsel %vm1265_vm4, %v1771_v1, 0 }
 0x9cc   : > { %3026 = vmatpush3.bf16.msra.mxu0 %v1776_v2  ;;  %v3259_v2 = vld [vmem:[%s4215_s29 + $0x8] sm:$0xff]  }
 0x9cd   : > { %3037 = vmatprep.subr.bf16.mxu0 %v3768_v31 }
 0x9ce   : > { %v1830_v13 = vpop.permute.xlu0 %1829 }
 0x9d0   : > { %v3288_v3 = vpop.eup %3287 }
 0x9d1   : > { %v1717_v5 = vmul.f32 %v3288_v3, %v3284_v59  ;;  %v3260_v3 = vld [vmem:[%s4215_s29] sm:$0xff]   ;;  %s4591_s29 = scalar_lea.vmem [#allocation18], %s4187_s19 }
 0x9d3   : > { %v1720_v6 = vpack.c.bf16 %v1717_v5, %v1717_v5 }
 0x9d4   : > { %v3290_v7 = vpop.eup %3289 }
 0x9d5   : > { %3022 = vmatmul.mubr.msk.bf16.vlgmr.msra.gmra.mxu1 %vm1124_vm3, %v1720_v6  ;;  %v1719_v9 = vmul.f32 %v3290_v7, %v3286_v61 }
 0x9d6   : > { %3032 = vmatpush3.bf16.xpose.msra.mxu1 %v1837_v8  ;;  %3033 = vmatprep.mubr.msk.bf16.mxu1 %vm3769_vm1, %v3768_v31 }
 0x9d7   : > { %v1721_v11 = vpack.c.bf16 %v1719_v9, %v1719_v9  ;;  %3043 = vmatprep.subr.bf16.mxu1 %v3768_v31 }
 0x9d9   : > { %3028 = vmatmul.mubr.msk.bf16.vlgmr.msra.gmra.mxu0 %vm1124_vm3, %v1721_v11 }
 0x9da   : > { %3038 = vmatpush3.bf16.xpose.msra.mxu0 %v1887_v12  ;;  %3039 = vmatprep.mubr.msk.bf16.mxu0 %vm3769_vm1, %v3768_v31 }
 0x9db   : > { %3049 = vmatprep.subr.bf16.mxu0 %v3768_v31 }
 0x9dd   : > { %3034 = vmatmul.mubr.msk.bf16.vlgmr.msra.gmra.mxu1 %vm1124_vm3, %v1830_v13 }
 0x9de   : > { %3045 = vmatprep.mubr.msk.bf16.mxu1 %vm3769_vm1, %v3768_v31 }
 0x9e1   : > { %3040 = vmatmul.mubr.msk.bf16.vlgmr.msra.gmra.mxu0 %vm1124_vm3, %v1880_v14 }
 0x9e2   : > { %3051 = vmatprep.mubr.msk.bf16.mxu0 %vm3769_vm1, %v3768_v31 }
 0xa95   : > { %v1764_v15 = vpop.f32.mrf.mxu1 }
 0xa97   : > { %v3023_v16 = vpop.f32.mrf.mxu1 }
 0xa99   : > { %v1767_v17 = vpop.f32.mrf.mxu1  ;;  %v1812_v18 = vpop.f32.mrf.mxu0 }
 0xa9a   : > { %v2864_v17 = vld [vmem:[%s820_s10] ss:$0 sm:$0xff]  ;;  %s4587_s10 = scalar_lea.vmem [#allocation14], %s4187_s19 }
 0xa9b   : > { %v3024_v19 = vpop.f32.mrf.mxu1  ;;  %v3029_v20 = vpop.f32.mrf.mxu0 }
 0xa9d   : > { %v1815_v21 = vpop.f32.mrf.mxu0  ;;  %v1873_v23 = vpop.f32.mrf.mxu1 }
 0xa9e   : > { %v1929_v24 = vmul.f32 0.35355338, %v1873_v23 }
 0xa9f   : > { %v3030_v26 = vpop.f32.mrf.mxu0  ;;  %v3035_v27 = vpop.f32.mrf.mxu1 }
 0xaa0   : > { %v1931_v28 = vadd.f32 %v4274_v50, %v1929_v24 }
 0xaa1   : > { %v1876_v29 = vpop.f32.mrf.mxu1  ;;  %v1923_v30 = vpop.f32.mrf.mxu0 }
 0xaa2   : > { %v1930_v32 = vmul.f32 0.35355338, %v1923_v30  ;;  %v1933_v35 = vsel %vm1124_vm3, %v1931_v28, -inf }
 0xaa3   : > { %1934 = vmax.xlane.f32.xlu0 %v1933_v35  ;;  %v3036_v36 = vpop.f32.mrf.mxu1  ;;  %v3041_v37 = vpop.f32.mrf.mxu0 }
 0xaa4   : > { %v1932_v38 = vadd.f32 %v4277_v56, %v1930_v32 }
 0xaa5   : > { %v1926_v39 = vpop.f32.mrf.mxu0 }
 0xaa6   : > { %v1936_v41 = vsel %vm1124_vm3, %v1932_v38, -inf }
 0xaa7   : > { %1937 = vmax.xlane.f32.xlu1 %v1936_v41  ;;  %v3042_v42 = vpop.f32.mrf.mxu0 }
 0xab8   : > { %1957 = vrot.lane.b32.xlu1 %v4256_v40, %s3780_s18 }
 0xabc   : > { %1585 = vrot.lane.b32.xlu1 %v4344_v22, %s3781_s3 }
 0xac0   : > { %1587 = vrot.lane.b32.xlu1 %v4346_v25, %s3781_s3 }
 0xac4   : > { %1822 = vrot.lane.b32.xlu1 %v1812_v18, %s3782_s1 }
 0xb2c   : > { %v1935_v50 = vpop.xlane.xlu0 %1934 }
 0xb2d   : > { %v1939_v43 = vsub.f32 %v1931_v28, %v1935_v50  ;;  %v3262_v50 = vld [vmem:[%s4220_s0] sm:$0xff]  }
 0xb2f   : > { %v1941_v45 = vmul.f32 1.442695, %v1939_v43 }
 0xb30   : > { %v1938_v56 = vpop.xlane.xlu1 %1937 }
 0xb31   : > { %3291 = vpow2.f32 %v1941_v45  ;;  %v1940_v46 = vsub.f32 %v1932_v38, %v1938_v56 }
 0xb33   : > { %v1943_v47 = vmul.f32 1.442695, %v1940_v46 }
 0xb34   : > { %v1958_v48 = vpop.permute.xlu1 %1957 }
 0xb35   : > { %3293 = vpow2.f32 %v1943_v47  ;;  %v1963_v49 = vsel %vm1265_vm4, %v1958_v48, 0 }
 0xb36   : > { %3044 = vmatpush3.bf16.msra.mxu1 %v1963_v49 }
 0xb37   : > { %3055 = vmatprep.subr.bf16.mxu1 %v3768_v31 }
 0xb38   : > { %v1586_v40 = vpop.permute.xlu1 %1585 }
 0xb39   : > { %1592 = vst.msk [vmem:[#allocation3] sm:$0xff] %vm1591_vm5, %v1586_v40 }
 0xb3c   : > { %v1588_v22 = vpop.permute.xlu1 %1587 }
 0xb3d   : > { %1593 = vst.msk [vmem:[#allocation3 + $0x8] sm:$0xff] %vm1591_vm5, %v1588_v22  ;;  %v2868_v22 = vld [vmem:[%s4587_s10] ss:$0 sm:$0xff] }
 0xb3e   : > { %v3292_v25 = vpop.eup %3291 }
 0xb3f   : > { %v1945_v51 = vsel %vm1124_vm3, %v3292_v25, 0.0 }
 0xb40   : > { %1946 = vadd.xlane.f32.xlu0 %v1945_v51  ;;  %v1823_v52 = vpop.permute.xlu1 %1822 }
 0xb41   : > { %1828 = vst.msk [vmem:[#allocation3 + $0x8] sm:$0xff] %vm1826_vm6, %v1823_v52 }
 0xb42   : > { %v3294_v53 = vpop.eup %3293 }
 0xb43   : > { %v1948_v54 = vsel %vm1124_vm3, %v3294_v53, 0.0 }
 0xb44   : > { %1949 = vadd.xlane.f32.xlu0 %v1948_v54 }
 0xb5a   : > { %2005 = vrot.lane.b32.xlu0 %v4259_v44, %s3780_s18  ;;  %s4595_s18 = sld [smem:[#allocation44_spill]] (!%p2882_p2) }
 0xb5e   : > { %1820 = vrot.lane.b32.xlu0 %v1764_v15, %s3782_s1 }
 0xbc9   : > { %v1947_v55 = vpop.xlane.xlu0 %1946 }
 0xbca   : > { %3295 = vrcp.f32 %v1947_v55 }
 0xbcd   : > { %v1950_v57 = vpop.xlane.xlu0 %1949 }
 0xbce   : > { %3297 = vrcp.f32 %v1950_v57 }
 0xbd1   : > { %v2006_v58 = vpop.permute.xlu0 %2005 }
 0xbd2   : > { %v2011_v59 = vsel %vm1265_vm4, %v2006_v58, 0 }
 0xbd3   : > { %3050 = vmatpush3.bf16.msra.mxu0 %v2011_v59  ;;  %v3263_v59 = vld [vmem:[%s4225_s27 + $0x18] sm:$0xff]  }
 0xbd4   : > { %3063 = vmatprep.subr.bf16.mxu0 %v3768_v31 }
 0xbd5   : > { %v1821_v60 = vpop.permute.xlu0 %1820 }
 0xbd6   : > { %1827 = vst.msk [vmem:[#allocation3] sm:$0xff] %vm1826_vm6, %v1821_v60  ;;  %v3264_v60 = vld [vmem:[%s4225_s27 + $0x10] sm:$0xff]  }
 0xbd7   : > { %v3296_v61 = vpop.eup %3295 }
 0xbd8   : > { %v1952_v62 = vmul.f32 %v3296_v61, %v3292_v25  ;;  %v3265_v61 = vld [vmem:[%s4225_s27 + $0x8] sm:$0xff]  }
 0xbda   : > { %v1955_v63 = vpack.c.bf16 %v1952_v62, %v1952_v62  ;;  %v3266_v62 = vld [vmem:[%s4225_s27] sm:$0xff]   ;;  %s4590_s27 = scalar_lea.vmem [#allocation17], %s4187_s19 }
 0xbdb   : > { %v3298_v44 = vpop.eup %3297 }
 0xbdc   : > { %3046 = vmatmul.mubr.msk.bf16.vlgmr.msra.gmra.mxu1 %vm1124_vm3, %v1955_v63  ;;  %v1954_v0 = vmul.f32 %v3298_v44, %v3294_v53  ;;  %v2870_v63 = vld [vmem:[%s4589_s4] ss:$0 sm:$0xff] }
 0xbdd   : > { %3059 = vmatprep.mubr.msk.bf16.mxu1 %vm3769_vm1, %v3768_v31  ;;  %3056 = vmatpush3.bf16.msra.mxu1 %v3259_v2 }
 0xbde   : > { %v1956_v1 = vpack.c.bf16 %v1954_v0, %v1954_v0  ;;  %3057 = vmatprep.subr.bf16.mxu1 %v3768_v31 }
 0xbe0   : > { %3052 = vmatmul.mubr.msk.bf16.vlgmr.msra.gmra.mxu0 %vm1124_vm3, %v1956_v1 }
 0xbe1   : > { %3067 = vmatprep.mubr.msk.bf16.mxu0 %vm3769_vm1, %v3768_v31  ;;  %3058 = vmatpush3.bf16.msra.mxu1 %v3260_v3 }
 0xbe2   : > { %3071 = vmatprep.subr.bf16.mxu1 %v3768_v31 }
 0xc9c   : > { %v1999_v4 = vpop.f32.mrf.mxu1 }
 0xc9d   : > { %2055 = vrot.lane.b32.xlu0 %v1999_v4, %s3783_s28 }
 0xc9e   : > { %v3047_v5 = vpop.f32.mrf.mxu1 }
 0xca0   : > { %v2002_v6 = vpop.f32.mrf.mxu1  ;;  %v2047_v7 = vpop.f32.mrf.mxu0 }
 0xca1   : > { %2057 = vrot.lane.b32.xlu1 %v2047_v7, %s3783_s28 }
 0xca2   : > { %v3048_v8 = vpop.f32.mrf.mxu1  ;;  %v3053_v9 = vpop.f32.mrf.mxu0 }
 0xca4   : > { %v2050_v10 = vpop.f32.mrf.mxu0 }
 0xca6   : > { %v3054_v11 = vpop.f32.mrf.mxu0 }
 0xd0f   : > { %v2056_v12 = vpop.permute.xlu0 %2055 }
 0xd10   : > { %2062 = vst.msk [vmem:[#allocation3] sm:$0xff] %vm2061_vm7, %v2056_v12 }
 0xd13   : > { %v2058_v13 = vpop.permute.xlu1 %2057 }
 0xd14   : > { %2063 = vst.msk [vmem:[#allocation3 + $0x8] sm:$0xff] %vm2061_vm7, %v2058_v13 }
 0xd17   : > { %v2064_v14 = vld [vmem:[#allocation3] sm:$0xff] }
 0xd1b   : > { %v2065_v15 = vld [vmem:[#allocation3 + $0x8] sm:$0xff] }
 0xd1c   : > { %v2066_v16 = vpack.c.bf16 %v2065_v15, %v2064_v14 }
 0xd1e   : > { %3060 = vmatmul.mubr.msk.bf16.vlgmr.msra.gmra.mxu1 %vm1072_vm2, %v2066_v16 }
 0xd1f   : > { %3079 = vmatprep.mubr.msk.bf16.mxu1 %vm3769_vm1, %v3768_v31  ;;  %3072 = vmatpush3.bf16.msra.mxu1 %v3263_v59 }
 0xd20   : > { %3073 = vmatprep.subr.bf16.mxu1 %v3768_v31 }
 0xd23   : > { %3074 = vmatpush3.bf16.msra.mxu1 %v3264_v60 }
 0xd24   : > { %3075 = vmatprep.subr.bf16.mxu1 %v3768_v31 }
 0xd27   : > { %3076 = vmatpush3.bf16.msra.mxu1 %v3265_v61 }
 0xd28   : > { %3077 = vmatprep.subr.bf16.mxu1 %v3768_v31 }
 0xd2b   : > { %3078 = vmatpush3.bf16.msra.mxu1 %v3266_v62 }
 0xdde   : > { %v2127_v18 = vpop.f32.mrf.mxu1 }
 0xddf   : > { %v2128_v19 = vadd.f32 %v2864_v17, %v2127_v18 }
 0xde0   : > { %v3061_v20 = vpop.f32.mrf.mxu1 }
 0xde1   : > { %v2134_v21 = vadd.f32 %v2128_v19, %v4241_v33 }
 0xde2   : > { %v2130_v23 = vpop.f32.mrf.mxu1 }
 0xde3   : > { %v2131_v24 = vadd.f32 %v2864_v17, %v2130_v23  ;;  %v2138_v26 = vsel %vm1072_vm2, %v2134_v21, 0.0 }
 0xde4   : > { %2139 = vadd.xlane.f32.xlu0 %v2138_v26  ;;  %v3062_v27 = vpop.f32.mrf.mxu1 }
 0xde5   : > { %v2135_v28 = vadd.f32 %v2131_v24, %v4243_v34  ;;  %v3261_v34 = vld [vmem:[%s4220_s0 + $0x8] sm:$0xff]   ;;  %s4588_s0 = scalar_lea.vmem [#allocation15], %s4187_s19  ;;  %v2874_v24 = vld [vmem:[%s4590_s27] ss:$0 sm:$0xff] }
 0xde6   : > { %3064 = vmatpush3.bf16.msra.mxu0 %v3261_v34  ;;  %v2869_v53 = vld [vmem:[%s4588_s0] ss:$0 sm:$0xff] }
 0xde7   : > { %v2141_v29 = vsel %vm1072_vm2, %v2135_v28, 0.0  ;;  %3065 = vmatprep.subr.bf16.mxu0 %v3768_v31 }
 0xde8   : > { %2142 = vadd.xlane.f32.xlu1 %v2141_v29 }
 0xdea   : > { %3066 = vmatpush3.bf16.msra.mxu0 %v3262_v50 }
 0xe6d   : > { %v2140_v30 = vpop.xlane.xlu0 %2139 }
 0xe6e   : > { %v2145_v32 = vmul.f32 0.03125, %v2140_v30 }
 0xe70   : > { %v2147_v35 = vsub.f32 %v2134_v21, %v2145_v32 }
 0xe71   : > { %v2143_v36 = vpop.xlane.xlu1 %2142 }
 0xe72   : > { %v2146_v37 = vmul.f32 0.03125, %v2143_v36  ;;  %v2149_v38 = vmul.f32 %v2147_v35, %v2147_v35 }
 0xe74   : > { %v2148_v33 = vsub.f32 %v2135_v28, %v2146_v37  ;;  %v2151_v39 = vsel %vm1072_vm2, %v2149_v38, 0.0 }
 0xe75   : > { %2152 = vadd.xlane.f32.xlu0 %v2151_v39 }
 0xe76   : > { %v2150_v41 = vmul.f32 %v2148_v33, %v2148_v33 }
 0xe78   : > { %v2154_v42 = vsel %vm1072_vm2, %v2150_v41, 0.0 }
 0xe79   : > { %2155 = vadd.xlane.f32.xlu0 %v2154_v42 }
 0xefe   : > { %v2153_v43 = vpop.xlane.xlu0 %2152 }
 0xeff   : > { %v2157_v45 = vmul.f32 0.03125, %v2153_v43 }
 0xf01   : > { %v2159_v56 = vadd.f32 1e-12, %v2157_v45 }
 0xf02   : > { %v2156_v46 = vpop.xlane.xlu0 %2155 }
 0xf03   : > { %3299 = vrsqrt.f32 %v2159_v56  ;;  %v2158_v47 = vmul.f32 0.03125, %v2156_v46 }
 0xf05   : > { %v2160_v48 = vadd.f32 1e-12, %v2158_v47 }
 0xf07   : > { %3301 = vrsqrt.f32 %v2160_v48 }
 0xf10   : > { %v3300_v49 = vpop.eup %3299 }
 0xf11   : > { %v2163_v40 = vmul.f32 %v3300_v49, %v2147_v35 }
 0xf13   : > { %v2171_v52 = vmul.f32 %v2868_v22, %v2163_v40 }
 0xf14   : > { %v3302_v25 = vpop.eup %3301 }
 0xf15   : > { %v2164_v51 = vmul.f32 %v3302_v25, %v2148_v33  ;;  %v2179_v55 = vadd.f32 %v2869_v53, %v2171_v52  ;;  %v2880_v52 = vld [vmem:[%s4591_s29] ss:$0 sm:$0xff] }
 0xf17   : > { %v2172_v54 = vmul.f32 %v2868_v22, %v2164_v51 }
 0xf19   : > { %v2180_v57 = vadd.f32 %v2869_v53, %v2172_v54  ;;  %v2881_v54 = vld [vmem:[%s4592_s26] ss:$0 sm:$0xff] }
 0xf1b   : > { %v2181_v58 = vpack.c.bf16 %v2180_v57, %v2179_v55 }
 0xf1d   : > { %3068 = vmatmul.mubr.msk.bf16.vlgmr.msra.gmra.mxu0 %vm1072_vm2, %v2181_v58 }
 0xfdd   : > { %v2242_v44 = vpop.f32.mrf.mxu0 }
 0xfde   : > { %v2243_v0 = vadd.f32 %v2870_v63, %v2242_v44 }
 0xfdf   : > { %v3069_v1 = vpop.f32.mrf.mxu0 }
 0xfe0   : > { %v2249_v2 = vmul.f32 %v2243_v0, %v2243_v0 }
 0xfe1   : > { %v2245_v3 = vpop.f32.mrf.mxu0 }
 0xfe2   : > { %v2251_v4 = vmul.f32 %v2249_v2, %v2243_v0  ;;  %v2246_v5 = vadd.f32 %v2870_v63, %v2245_v3 }
 0xfe3   : > { %v3070_v6 = vpop.f32.mrf.mxu0 }
 0xfe4   : > { %v2253_v7 = vmul.f32 0.044715, %v2251_v4  ;;  %v2250_v8 = vmul.f32 %v2246_v5, %v2246_v5 }
 0xfe6   : > { %v2255_v9 = vadd.f32 %v2253_v7, %v2243_v0  ;;  %v2252_v10 = vmul.f32 %v2250_v8, %v2246_v5 }
 0xfe8   : > { %v2257_v11 = vmul.f32 0.7978846, %v2255_v9  ;;  %v2254_v12 = vmul.f32 0.044715, %v2252_v10 }
 0xfea   : > { %3303 = vtanh.f32 %v2257_v11  ;;  %v2256_v31 = vadd.f32 %v2254_v12, %v2246_v5 }
 0xfec   : > { %v2258_v13 = vmul.f32 0.7978846, %v2256_v31 }
 0xfee   : > { %3305 = vtanh.f32 %v2258_v13 }
 0xff7   : > { %v3304_v14 = vpop.eup %3303 }
 0xff8   : > { %v2261_v15 = vadd.f32 1.0, %v3304_v14 }
 0xffa   : > { %v2263_v17 = vmul.f32 0.5, %v2261_v15 }
 0xffb   : > { %v3306_v16 = vpop.eup %3305 }
 0xffc   : > { %v2262_v18 = vadd.f32 1.0, %v3306_v16  ;;  %v2265_v20 = vmul.f32 %v2263_v17, %v2243_v0 }
 0xffe   : > { %v2264_v19 = vmul.f32 0.5, %v2262_v18 }
0x1000   : > { %v2266_v21 = vmul.f32 %v2264_v19, %v2246_v5 }
0x1002   : > { %v2267_v23 = vpack.c.bf16 %v2266_v21, %v2265_v20 }
0x1004   : > { %3080 = vmatmul.mubr.msk.bf16.vlgmr.msra.gmra.mxu1 %vm2307_vm8, %v2267_v23 }
0x10c4   : > { %v2345_v26 = vpop.f32.mrf.mxu1 }
0x10c5   : > { %v2346_v27 = vadd.f32 %v2874_v24, %v2345_v26 }
0x10c6   : > { %v3081_v28 = vpop.f32.mrf.mxu1 }
0x10c7   : > { %v2352_v29 = vadd.f32 %v2346_v27, %v2179_v55 }
0x10c8   : > { %v2348_v30 = vpop.f32.mrf.mxu1 }
0x10c9   : > { %v2349_v32 = vadd.f32 %v2874_v24, %v2348_v30  ;;  %v2356_v35 = vsel %vm1072_vm2, %v2352_v29, 0.0 }
0x10ca   : > { %2357 = vadd.xlane.f32.xlu1 %v2356_v35  ;;  %v3082_v36 = vpop.f32.mrf.mxu1 }
0x10cb   : > { %v2353_v37 = vadd.f32 %v2349_v32, %v2180_v57 }
0x10cd   : > { %v2359_v38 = vsel %vm1072_vm2, %v2353_v37, 0.0 }
0x10ce   : > { %2360 = vadd.xlane.f32.xlu0 %v2359_v38 }
0x1153   : > { %v2358_v33 = vpop.xlane.xlu1 %2357 }
0x1154   : > { %v2362_v39 = vmul.f32 0.03125, %v2358_v33 }
0x1156   : > { %v2364_v41 = vsub.f32 %v2352_v29, %v2362_v39 }
0x1157   : > { %v2361_v42 = vpop.xlane.xlu0 %2360 }
0x1158   : > { %v2363_v34 = vmul.f32 0.03125, %v2361_v42  ;;  %v2366_v50 = vmul.f32 %v2364_v41, %v2364_v41 }
0x115a   : > { %v2365_v43 = vsub.f32 %v2353_v37, %v2363_v34  ;;  %v2368_v45 = vsel %vm1072_vm2, %v2366_v50, 0.0 }
0x115b   : > { %2369 = vadd.xlane.f32.xlu1 %v2368_v45 }
0x115c   : > { %v2367_v56 = vmul.f32 %v2365_v43, %v2365_v43 }
0x115e   : > { %v2371_v46 = vsel %vm1072_vm2, %v2367_v56, 0.0 }
0x115f   : > { %2372 = vadd.xlane.f32.xlu0 %v2371_v46 }
0x11e4   : > { %v2370_v47 = vpop.xlane.xlu1 %2369 }
0x11e5   : > { %v2374_v48 = vmul.f32 0.03125, %v2370_v47 }
0x11e7   : > { %v2376_v49 = vadd.f32 1e-12, %v2374_v48 }
0x11e8   : > { %v2373_v40 = vpop.xlane.xlu0 %2372 }
0x11e9   : > { %3307 = vrsqrt.f32 %v2376_v49  ;;  %v2375_v22 = vmul.f32 0.03125, %v2373_v40 }
0x11eb   : > { %v2377_v25 = vadd.f32 1e-12, %v2375_v22 }
0x11ed   : > { %3309 = vrsqrt.f32 %v2377_v25 }
0x11f6   : > { %v3308_v51 = vpop.eup %3307 }
0x11f7   : > { %v2380_v53 = vmul.f32 %v3308_v51, %v2364_v41 }
0x11f9   : > { %v2388_v55 = vmul.f32 %v2880_v52, %v2380_v53 }
0x11fa   : > { %v3310_v57 = vpop.eup %3309 }
0x11fb   : > { %v2396_v58 = vadd.f32 %v2881_v54, %v2388_v55  ;;  %v2381_v59 = vmul.f32 %v3310_v57, %v2365_v43 }
0x11fd   : > { %2398 = vst.msk [vmem:[#allocation2] sm:$0xff] %vm1072_vm2, %v2396_v58  ;;  %v2389_v60 = vmul.f32 %v2880_v52, %v2381_v59  ;;  %2403 = sbr.rel (%p2882_p2) target bundleno = 5029 (0x13a5), region = 160 }
0x11ff   : > { %v2397_v61 = vadd.f32 %v2881_v54, %v2389_v60 }
0x1201   : > { %2399 = vst.msk [vmem:[#allocation2 + $0x8] sm:$0xff] %vm1072_vm2, %v2397_v61 }
0x1202   : > { %v3311_v62 = vld [vmem:[%s4593_s16 + $0x8] sm:$0xff]   ;;  %v3784_v63 = vmov 0.0   ;;  %v3312_v44 = vld [vmem:[%s4593_s16] sm:$0xff]   ;;  %vm3785_vm9 = vmmov 0  }
0x1203   : > { %3083 = vmatprep.subr.bf16.mxu0 %v3784_v63  ;;  %3091 = vmatprep.subr.bf16.mxu1 %v3784_v63  ;;  %v3313_v2 = vld [vmem:[%s4594_s21 + $0x8] sm:$0xff]   ;;  %v3314_v3 = vld [vmem:[%s4594_s21] sm:$0xff]  }
0x1204   : > { %3084 = vmatpush3.bf16.msra.mxu0 %v3311_v62  ;;  %3087 = vmatprep.mubr.msk.bf16.mxu0 %vm3785_vm9, %v3784_v63  ;;  %v2883_v4 = vld [vmem:[#allocation20] ss:$0 sm:$0xff]  ;;  %v2887_v12 = vld [vmem:[%s4595_s18] ss:$0 sm:$0xff] }
0x1205   : > { %3085 = vmatprep.subr.bf16.mxu0 %v3784_v63  ;;  %3095 = vmatprep.mubr.msk.bf16.mxu1 %vm3785_vm9, %v3784_v63 }
0x1206   : > { %3092 = vmatpush3.bf16.msra.mxu1 %v3313_v2 }
0x1207   : > { %3093 = vmatprep.subr.bf16.mxu1 %v3784_v63 }
0x1208   : > { %v2404_v0 = vld [vmem:[#allocation2] ss:$8 sm:$0x3]  ;;  %3086 = vmatpush3.bf16.msra.mxu0 %v3312_v44 }
0x1209   : > { %v2405_v1 = vpack.c.bf16 %v2404_v0, %v2404_v0 }
0x120a   : > { %3094 = vmatpush3.bf16.msra.mxu1 %v3314_v3 }
0x120b   : > { %3088 = vmatmul.mubr.msk.bf16.vlgmr.msra.gmra.mxu0 %vm1072_vm2, %v2405_v1 }
0x12cb   : > { %v2466_v5 = vpop.f32.mrf.mxu0 }
0x12cc   : > { %v2467_v6 = vadd.f32 %v2883_v4, %v2466_v5 }
0x12cd   : > { %v3089_v7 = vpop.f32.mrf.mxu0 }
0x12ce   : > { %3315 = vtanh.f32 %v2467_v6 }
0x12cf   : > { %v2469_v8 = vpop.f32.mrf.mxu0 }
0x12d1   : > { %v3090_v9 = vpop.f32.mrf.mxu0 }
0x12db   : > { %v3316_v10 = vpop.eup %3315 }
0x12dc   : > { %v2473_v11 = vpack.c.bf16 %v3316_v10, %v3316_v10 }
0x12de   : > { %3096 = vmatmul.mubr.msk.bf16.vlgmr.msra.gmra.mxu1 %vm1072_vm2, %v2473_v11 }
0x139e   : > { %v2534_v31 = vpop.f32.mrf.mxu1 }
0x139f   : > { %v2535_v13 = vadd.f32 %v2887_v12, %v2534_v31 }
0x13a0   : > { %v3097_v14 = vpop.f32.mrf.mxu1 }
0x13a1   : > { %2540 = vst [vmem:[#allocation21] sm:$0x3] %v2535_v13 }
0x13a2   : > { %v2537_v15 = vpop.f32.mrf.mxu1 }
0x13a4   : > { %v3098_v16 = vpop.f32.mrf.mxu1 }
0x13a5 PF: > { %p3191_p0 = scmp.eq.s32.totalorder %s3911_s2, 1  ;;  %s3786_s3 = smov [#allocation21]  }
0x13a6   : > { %s2548_s1 = sshll.u32 %s3786_s3, 4  ;;  %s2549_s1 = int_to_ptr.vmem [resolvable:$true] %s2548_s1 }
0x13a7   : > { %s3671_s28 = scalar_lea.vmem %s2549_s1, 32  ;;  %p3678_p11 = scmp.lt.s32.totalorder %s2549_s1, %s2549_s1 }
0x13a8   : > { %p3672_p7 = scmp.ne.s32.totalorder %s2549_s1, %s3671_s28  ;;  %p3679_p6 = scmp.lt.s32.totalorder %s3671_s28, %s3671_s28 }
0x13aa   : > { %p3673_p9 = pnand %p3672_p7, %p3191_p0  ;;  %p3680_p8 = por %p3679_p6, %p3678_p11 }
0x13ac   : > { %p3674_p12 = pneg %p3673_p9 }
0x13ae   : > { %p3681_p10 = pnand %p3680_p8, %p3674_p12 }
0x13b0   : > { %3684 = shalt.err (!%p3681_p10)
}
0x13b1   : > { %s4596_s4 = sld [smem:[#allocation45_spill]] }
0x13b7   : > { %3136 = dma.vmem_to_hbm [thread:$0]  (%p3191_p0), %s2549_s1, 32, %s4596_s4, [#allocation6]  }
0x13b8   : > { %3732 = dma.done.wait (%p3191_p0), [#allocation6], 32  }
0x13b9   : > { %3734 = vsyncadd (%p3191_p0), [#allocation6], 4294967264 }
0x13ba PF: > { %s4597_s24 = sld [smem:[#allocation30_spill]] }
0x13bb   : > { %s4598_s1 = sld [smem:[#allocation28_spill]] }
0x13bc   : > { %s4599_s22 = sld [smem:[#allocation29_spill]] }
0x13bd   : > { %s4600_s23 = sld [smem:[#allocation31_spill]] }
0x13c0   : > { %p31_p1 = scmp.ge.s32.totalorder %s4597_s24, 4  }
0x13c2   :  { %33 = sbr.rel (!%p31_p1) target bundleno = 19 (0x13), region = 253 }
0x13c7   :  { %2561 = vsyncpa [#allocation5], 1 }
0x13c8   :  { %2563 = vsyncpa [#allocation5 + $0x1], 1 }
0x13c9   :  { %2564 = vsyncpa [#allocation8], 1 }
0x13ca   :  { %2565 = vsyncpa [#allocation11], 1 }
0x13cb   :  { %2566 = vsyncpa [#allocation6], 1 }
0x13cc   :  { %2568 = vsyncpa [#allocation6 + $0x1], 1 }

</bundles_post_ra>
